<compile_context>
chip_gen: v6e
topology: v6e:2x2x1
jax: 0.10.0
libtpu: 0.0.40
codegen_flags: <defaults>
</compile_context>

<pallas_src>
import jax
import jax.numpy as jnp
from jax.experimental import pallas as pl
from jax.experimental.pallas import tpu as pltpu


def _round_up(x, m):
    return ((x + m - 1) // m) * m


def _grid_semantics_and_cores():
    """Pick batch-axis grid semantics + TensorCore count per chip generation.

    v7x has 2 TensorCores/chip: CORE_PARALLEL actually shards the batch grid
    axis across them (plain "parallel" has ~zero measured impact).  v5e/v6e
    have a single TC, so keep "parallel".
    """
    try:
        kind = jax.devices()[0].device_kind.lower()
    except Exception:
        kind = ""
    if ("v7" in kind) or ("7x" in kind):
        return pltpu.CORE_PARALLEL, 2
    return "parallel", 1


def _choose_tm(batch, num_cores):
    """Batch-tile rows: >=2 tiles per TensorCore so tile i's compute hides under
    tile i+1's DMA; multiple of 16 (bf16 sublane packing); capped at 512 rows
    (v6e measured ~85% of HBM roofline at 512-row tiles)."""
    target_tiles = 2 * num_cores
    tm = _round_up(max(1, pl.cdiv(batch, target_tiles)), 16)
    return int(max(16, min(512, tm)))


def _two_stream_head_kernel(x1_ref, x2_ref, w1_ref, w2_ref, b_ref, o_ref):
    # Folded head: logits = x1 @ W1f + x2 @ W2f + bfold (f32 accumulate), then a
    # numerically-stable exact softmax along the class dim in f32.
    wdt = w1_ref.dtype
    x1 = x1_ref[...]
    x2 = x2_ref[...]
    if x1.dtype != wdt:
        # Trace-time branch only.  Activations already arrived as narrow (bf16)
        # bytes over HBM; this in-VMEM upcast costs no DMA and keeps the matmul
        # operand dtypes matched when the folded weights are kept in f32.
        x1 = x1.astype(wdt)
        x2 = x2.astype(wdt)
    # NOTE: a single K=(F1+F2) dot with stacked weights is only worthwhile if
    # the upstream hands us pre-concatenated features (don't add a concat op).
    logits = (jnp.dot(x1, w1_ref[...], preferred_element_type=jnp.float32)
              + jnp.dot(x2, w2_ref[...], preferred_element_type=jnp.float32)
              + b_ref[...])
    m = jnp.max(logits, axis=1, keepdims=True)
    e = jnp.exp(logits - m)
    # Exact divide: the kernel is HBM-bound, so exact reciprocal is free and
    # per-row probabilities sum to 1 to f32 accuracy.
    probs = e / jnp.sum(e, axis=1, keepdims=True)
    o_ref[...] = probs.astype(o_ref.dtype)


def fold_params(params, *, weight_dtype=jnp.float32, lane_pad=128):
    """One-time (load-time) algebraic fold of the three Linear layers.

    cat([x1@W1+b1, x2@W2+b2], 1) @ Wf + bf
        == x1 @ (W1 @ Wf[:H]) + x2 @ (W2 @ Wf[H:]) + (b1@Wf[:H] + b2@Wf[H:] + bf)

    Also lane-pads the class dim to a multiple of 128 (padded classes get a
    -1e30 bias -> ~0 probability in the f32 logit path) so the output slab and
    the in-kernel softmax reduction are lane-dense / unmasked.

    weight_dtype defaults to f32: the folded weights are tiny, DMA'd once per
    call (constant index_map), and keeping them wide avoids compounding the
    quantization of three composed Linears.  Pass bf16 for very large heads.
    """
    w1, b1, w2, b2, wf, bf = (params["w1"], params["b1"], params["w2"],
                              params["b2"], params["wf"], params["bf"])
    H = w1.shape[1]
    wf1, wf2 = wf[:H, :], wf[H:, :]
    w1f = (w1 @ wf1).astype(jnp.float32)                       # (F1, C)
    w2f = (w2 @ wf2).astype(jnp.float32)                       # (F2, C)
    bfold = (b1 @ wf1 + b2 @ wf2 + bf).astype(jnp.float32)     # (C,)

    C = bfold.shape[0]
    Cp = _round_up(C, lane_pad)
    if Cp != C:
        w1f = jnp.pad(w1f, ((0, 0), (0, Cp - C)))
        w2f = jnp.pad(w2f, ((0, 0), (0, Cp - C)))
        bfold = jnp.pad(bfold, (0, Cp - C), constant_values=-1e30)

    return {
        "w1f": w1f.astype(weight_dtype),
        "w2f": w2f.astype(weight_dtype),
        "bfold": bfold.reshape(1, Cp).astype(jnp.float32),
        "num_classes": C,
    }


def two_stream_forward(x1, x2, folded, *, tm=None, out_dtype=jnp.float32,
                       return_padded=False):
    """x1:(B,F1), x2:(B,F2) pooled backbone features (ideally bf16 from the
    producer) -> (B, num_classes) class probabilities."""
    B, F1 = x1.shape
    _, F2 = x2.shape
    w1f, w2f, bfold = folded["w1f"], folded["w2f"], folded["bfold"]
    Cp = bfold.shape[1]
    C = folded["num_classes"]

    semantics, num_cores = _grid_semantics_and_cores()
    if tm is None:
        tm = _choose_tm(B, num_cores)

    # No batch padding: Pallas masks the ragged trailing tile.
    grid = (pl.cdiv(B, tm),)

    # Scoped VMEM sized from actual buffers: double-buffered activation/output
    # tiles plus the constant-index weights/bias (DMA'd once, but two buffers
    # are allocated by the default pipeliner), with headroom; keep <=32 MiB
    # (v7x has only 64 MiB physical VMEM per TC).
    itm_x = jnp.dtype(x1.dtype).itemsize
    itm_w = jnp.dtype(w1f.dtype).itemsize
    itm_o = jnp.dtype(out_dtype).itemsize
    needed = (2 * tm * (F1 + F2) * itm_x
              + 2 * tm * Cp * itm_o
              + 2 * ((F1 + F2) * Cp * itm_w + Cp * 4))
    vmem_limit = int(min(max(needed + (4 << 20), 8 << 20), 32 << 20))

    out = pl.pallas_call(
        _two_stream_head_kernel,
        out_shape=jax.ShapeDtypeStruct((B, Cp), out_dtype),
        grid=grid,
        in_specs=[
            pl.BlockSpec((tm, F1), lambda i: (i, 0)),   # activations: tiled on B
            pl.BlockSpec((tm, F2), lambda i: (i, 0)),
            pl.BlockSpec((F1, Cp), lambda i: (0, 0)),   # weights: VMEM-resident
            pl.BlockSpec((F2, Cp), lambda i: (0, 0)),
            pl.BlockSpec((1, Cp), lambda i: (0, 0)),    # folded bias
        ],
        out_specs=pl.BlockSpec((tm, Cp), lambda i: (i, 0)),
        compiler_params=pltpu.CompilerParams(
            dimension_semantics=(semantics,),
            vmem_limit_bytes=vmem_limit),
    )(x1, x2, w1f, w2f, bfold)

    if return_padded:
        return out            # lane-dense (B, Cp) slab; padded classes ~0 prob
    return out[:, :C]


def init_params(key, feat1, feat2, inner_feature, num_classes):
    ks = jax.random.split(key, 6)
    scale = 0.02
    return {
        "w1": scale * jax.random.normal(ks[0], (feat1, inner_feature), jnp.float32),
        "b1": scale * jax.random.normal(ks[1], (inner_feature,), jnp.float32),
        "w2": scale * jax.random.normal(ks[2], (feat2, inner_feature), jnp.float32),
        "b2": scale * jax.random.normal(ks[3], (inner_feature,), jnp.float32),
        "wf": scale * jax.random.normal(ks[4], (2 * inner_feature, num_classes), jnp.float32),
        "bf": scale * jax.random.normal(ks[5], (num_classes,), jnp.float32),
    }


def _reference(x1, x2, p):
    # Unfused f32 reference matching the PyTorch module.
    h1 = x1 @ p["w1"] + p["b1"]
    h2 = x2 @ p["w2"] + p["b2"]
    logits = jnp.concatenate([h1, h2], axis=1) @ p["wf"] + p["bf"]
    return jax.nn.softmax(logits, axis=1)


if __name__ == "__main__":
    # Small shapes consistent with the module (pooled feature dims, fc head).
    # B is deliberately NOT a multiple of the batch tile -> exercises the
    # unpadded ragged-trailing-tile path.
    B = 300            # batch
    F1, F2 = 512, 512  # pooled backbone feature dims (fundus / OCT streams)
    INNER = 256        # inner_feature
    NUM_CLASSES = 5    # small class count (lane-padded to 128 inside)

    key = jax.random.PRNGKey(0)
    k_p, k_x1, k_x2 = jax.random.split(key, 3)
    params = init_params(k_p, F1, F2, INNER, NUM_CLASSES)
    folded = fold_params(params)            # one-time, load-time fold + pad

    # The backbone/pooling producer emits bf16 features (no wrapper cast op).
    x1 = jax.random.normal(k_x1, (B, F1), jnp.float32).astype(jnp.bfloat16)
    x2 = jax.random.normal(k_x2, (B, F2), jnp.float32).astype(jnp.bfloat16)

    out = two_stream_forward(x1, x2, folded)
    out = jax.block_until_ready(out)

    ref = _reference(x1.astype(jnp.float32), x2.astype(jnp.float32), params)
    assert out.shape == (B, NUM_CLASSES)
    # Probabilities over the real classes sum to ~1 (padded classes get ~0 mass;
    # exact softmax divide keeps this tight).
    assert jnp.allclose(jnp.sum(out, axis=1), 1.0, atol=1e-3)
    # f32 folded weights + f32 accumulate + exact softmax: tight tolerance; the
    # residual error is the bf16 feature quantization shared with the reference.
    assert jnp.allclose(out, ref, atol=5e-3, rtol=5e-3)

    print("KERNEL_OK")
</pallas_src>

<mosaic_0001>
module attributes {stable_mosaic.version = 11 : i64} {
  func.func @_two_stream_head_kernel(%arg0: i32, %arg1: memref<160x512xbf16, #tpu.memory_space<vmem>>, %arg2: memref<160x512xbf16, #tpu.memory_space<vmem>>, %arg3: memref<512x128xf32, #tpu.memory_space<vmem>>, %arg4: memref<512x128xf32, #tpu.memory_space<vmem>>, %arg5: memref<1x128xf32, #tpu.memory_space<vmem>>, %arg6: memref<160x128xf32, #tpu.memory_space<vmem>>) attributes {dimension_semantics = [#tpu.dimension_semantics<parallel>], iteration_bounds = array<i64: 2>, scalar_prefetch = 0 : i64, scratch_operands = 0 : i64, tpu.core_type = #tpu.core_type<tc>, window_params = [{transform_indices = @transform_0, window_bounds = array<i64: 160, 512>}, {transform_indices = @transform_1, window_bounds = array<i64: 160, 512>}, {pipeline_mode = #tpu.pipeline_mode<synchronous>, transform_indices = @transform_2, window_bounds = array<i64: 512, 128>}, {pipeline_mode = #tpu.pipeline_mode<synchronous>, transform_indices = @transform_3, window_bounds = array<i64: 512, 128>}, {pipeline_mode = #tpu.pipeline_mode<synchronous>, transform_indices = @transform_4, window_bounds = array<i64: 1, 128>}, {transform_indices = @transform_5, window_bounds = array<i64: 160, 128>}]} {
    %c0 = arith.constant 0 : index
    %c0_0 = arith.constant 0 : index
    %0 = vector.load %arg1[%c0, %c0_0] : memref<160x512xbf16, #tpu.memory_space<vmem>>, vector<160x512xbf16>
    %c0_1 = arith.constant 0 : index
    %c0_2 = arith.constant 0 : index
    %1 = vector.load %arg2[%c0_1, %c0_2] : memref<160x512xbf16, #tpu.memory_space<vmem>>, vector<160x512xbf16>
    %2 = arith.extf %0 : vector<160x512xbf16> to vector<160x512xf32>
    %3 = arith.extf %1 : vector<160x512xbf16> to vector<160x512xf32>
    %c0_3 = arith.constant 0 : index
    %c0_4 = arith.constant 0 : index
    %4 = vector.load %arg3[%c0_3, %c0_4] : memref<512x128xf32, #tpu.memory_space<vmem>>, vector<512x128xf32>
    %cst = arith.constant dense<0.000000e+00> : vector<160x128xf32>
    %5 = tpu.matmul %2, %4, %cst {dimension_numbers = #tpu.dot_dimension_numbers<[1], [0], [0], [1], [0, 0, 1, 1], [], []>} : vector<160x512xf32>, vector<512x128xf32>, vector<160x128xf32> -> vector<160x128xf32>
    %c0_5 = arith.constant 0 : index
    %c0_6 = arith.constant 0 : index
    %6 = vector.load %arg4[%c0_5, %c0_6] : memref<512x128xf32, #tpu.memory_space<vmem>>, vector<512x128xf32>
    %cst_7 = arith.constant dense<0.000000e+00> : vector<160x128xf32>
    %7 = tpu.matmul %3, %6, %cst_7 {dimension_numbers = #tpu.dot_dimension_numbers<[1], [0], [0], [1], [0, 0, 1, 1], [], []>} : vector<160x512xf32>, vector<512x128xf32>, vector<160x128xf32> -> vector<160x128xf32>
    %8 = arith.addf %5, %7 : vector<160x128xf32>
    %c0_8 = arith.constant 0 : index
    %c0_9 = arith.constant 0 : index
    %9 = vector.load %arg5[%c0_8, %c0_9] : memref<1x128xf32, #tpu.memory_space<vmem>>, vector<1x128xf32>
    %10 = vector.broadcast %9 : vector<1x128xf32> to vector<160x128xf32>
    %11 = arith.addf %8, %10 : vector<160x128xf32>
    %cst_10 = arith.constant dense<0xFF800000> : vector<160xf32>
    %12 = vector.multi_reduction <maximumf>, %11, %cst_10 [1] : vector<160x128xf32> to vector<160xf32>
    %13 = vector.shape_cast %12 : vector<160xf32> to vector<160x1xf32>
    %14 = vector.broadcast %13 : vector<160x1xf32> to vector<160x128xf32>
    %15 = arith.subf %11, %14 : vector<160x128xf32>
    %16 = math.exp %15 : vector<160x128xf32>
    %cst_11 = arith.constant dense<0.000000e+00> : vector<160xf32>
    %17 = vector.multi_reduction <add>, %16, %cst_11 [1] : vector<160x128xf32> to vector<160xf32>
    %18 = vector.shape_cast %17 : vector<160xf32> to vector<160x1xf32>
    %19 = vector.broadcast %18 : vector<160x1xf32> to vector<160x128xf32>
    %20 = arith.divf %16, %19 : vector<160x128xf32>
    %c0_12 = arith.constant 0 : index
    %c0_13 = arith.constant 0 : index
    %21 = vector.load %arg6[%c0_12, %c0_13] : memref<160x128xf32, #tpu.memory_space<vmem>>, vector<160x128xf32>
    tpu.vector_store %arg6[%c0_12, %c0_13], %20 {strides = array<i32>} : memref<160x128xf32, #tpu.memory_space<vmem>>, vector<160x128xf32>,
    return
  }
  func.func @transform_0(%arg0: i32) -> (i32, i32) {
    %c0_i32 = arith.constant 0 : i32
    %c0_i32_0 = arith.constant 0 : i32
    return %arg0, %c0_i32 : i32, i32
  }
  func.func @transform_1(%arg0: i32) -> (i32, i32) {
    %c0_i32 = arith.constant 0 : i32
    %c0_i32_0 = arith.constant 0 : i32
    return %arg0, %c0_i32 : i32, i32
  }
  func.func @transform_2(%arg0: i32) -> (i32, i32) {
    %c0_i32 = arith.constant 0 : i32
    %c0_i32_0 = arith.constant 0 : i32
    %c0_i32_1 = arith.constant 0 : i32
    return %c0_i32, %c0_i32_0 : i32, i32
  }
  func.func @transform_3(%arg0: i32) -> (i32, i32) {
    %c0_i32 = arith.constant 0 : i32
    %c0_i32_0 = arith.constant 0 : i32
    %c0_i32_1 = arith.constant 0 : i32
    return %c0_i32, %c0_i32_0 : i32, i32
  }
  func.func @transform_4(%arg0: i32) -> (i32, i32) {
    %c0_i32 = arith.constant 0 : i32
    %c0_i32_0 = arith.constant 0 : i32
    %c0_i32_1 = arith.constant 0 : i32
    return %c0_i32, %c0_i32_0 : i32, i32
  }
  func.func @transform_5(%arg0: i32) -> (i32, i32) {
    %c0_i32 = arith.constant 0 : i32
    %c0_i32_0 = arith.constant 0 : i32
    return %arg0, %c0_i32 : i32, i32
  }
}

</mosaic_0001>

<bundles_post_ra>
// kernel: tpu_custom_call.1
= control target key start
LH: loop header
LB: loop body
LE: loop exit
PB: predicated region body
PF: predicated region fallthrough
CT: control target
= control target key end

     0   :  { %s2900_s0 = inlined_call_operand.hbm [shape: bf16[300,512], index: 0, kind: input, shape index: {}]   ;;  %s2901_s1 = inlined_call_operand.hbm [shape: bf16[300,512], index: 1, kind: input, shape index: {}]   ;;  %s2902_s2 = inlined_call_operand.hbm [shape: f32[512,128], index: 2, kind: input, shape index: {}]   ;;  %s2903_s3 = inlined_call_operand.hbm [shape: f32[512,128], index: 3, kind: input, shape index: {}]   ;;  %s2904_s4 = inlined_call_operand.vmem [shape: f32[1,128], index: 4, kind: input, shape index: {}]   ;;  %s2905_s5 = inlined_call_operand.hbm [shape: f32[300,128], index: 5, kind: output, shape index: {}]  }
   0x1   :  { %2909 = sst [smem:[#allocation16_spill]] %s2900_s0 }
   0x2   :  { %10 = vsyncpa [#allocation3], 0 }
   0x3   :  { %12 = vsyncpa [#allocation3 + $0x1], 0 }
   0x4   :  { %13 = vsyncpa [#allocation6], 0 }
   0x5   :  { %15 = vsyncpa [#allocation6 + $0x1], 0 }
   0x6   :  { %16 = vsyncpa [#allocation9], 0 }
   0x7   :  { %17 = vsyncpa [#allocation4], 0 }
   0x8   :  { %19 = vsyncpa [#allocation4 + $0x1], 0  ;;  %s2154_s18 = smov 0   ;;  %s2156_s19 = smov 0  }
   0x9   :  { %s2158_s20 = smov 0   ;;  %s2160_s21 = smov 0  }
   0xa LB: > { %s2175_s22 = sadd.s32 4294967295, %s2108_s21   ;;  %s1735_s23 = sadd.s32 4294967294, %s2108_s21   ;;  %s2108_s21 = sphi %s2160_s21, %s2928_s21   ;;  %s2104_s20 = sphi %s2158_s20, %s2927_s20   ;;  %s2100_s19 = sphi %s2156_s19, %s2926_s19   ;;  %s2096_s18 = sphi %s2154_s18, %s2925_s18  }
   0xb   : > { %s2179_s24 = sadd.s32 1, %s2108_s21   ;;  %s32_s25 = sadd.s32 1, %s2104_s20 }
   0xc   : > { %s29_s26 = ssub.s32 %s2108_s21, %s2179_s24  ;;  %p39_p0 = scmp.ne.s32.totalorder %s2104_s20, %s2100_s19 }
   0xd   : > { %p30_p1 = scmp.eq.s32.totalorder %s29_s26, 0  ;;  %p40_p2 = scmp.eq.s32.totalorder %s2108_s21, 0 }
   0xe   : > { %p45_p3 = scmp.ne.s32.totalorder %s2100_s19, %s2096_s18  ;;  %p2906_p4 = scmp.eq.s32.totalorder %s2175_s22, 0 }
   0xf   : > { %s2191_s27 = scalar_select %p30_p1, %s2104_s20, %s32_s25  }
  0x10   : > { %p2193_p5 = por %p40_p2, %p39_p0  ;;  %p2199_p6 = por %p2906_p4, %p45_p3 }
  0x11   : > { %p158_p7 = scmp.eq.s32.totalorder %s2175_s22, 1  ;;  %p164_p8 = scmp.eq.s32.totalorder %s1735_s23, 1 }
  0x12   : > { %s2911_s29 = scalar_select %p2199_p6, 1, 0 }
  0x13   : > { %p1736_p9 = scmp.ge.s32.totalorder %s2108_s21, 1  ;;  %p171_p10 = scmp.lt.s32.totalorder %s2108_s21, 3 }
  0x14   : > { %p2206_p11 = por %p158_p7, %p39_p0  ;;  %p2210_p12 = por %p164_p8, %p45_p3 }
  0x15   : > { %p2214_p13 = pnand %p1736_p9, %p171_p10  ;;  %s2110_s8 = smov [#allocation7]  }
  0x16   : > { %s2912_s30 = scalar_select %p2206_p11, 1, 0 }
  0x17   : > { %s2913_s6 = scalar_select %p2210_p12, 1, 0 }
  0x18   : > { %p1789_p1 = pneg %p2214_p13  ;;  %s183_s9 = sshll.u32 %s2110_s8, 4  ;;  %s184_s9 = int_to_ptr.vmem [resolvable:$true] %s183_s9 }
  0x19   : > { %s2111_s11 = smov [#allocation8]   ;;  %s1939_s13 = scalar_lea.vmem %s184_s9, 8192 }
  0x1a   : > { %p2222_p2 = pnand %p1789_p1, %p2906_p4  ;;  %s196_s12 = sshll.u32 %s2111_s11, 4  ;;  %s197_s12 = int_to_ptr.vmem [resolvable:$true] %s196_s12 }
  0x1b   : > { %p1940_p3 = scmp.ne.s32.totalorder %s184_s9, %s1939_s13  ;;  %p1947_p9 = scmp.lt.s32.totalorder %s184_s9, %s184_s9 }
  0x1c   : > { %p1930_p0 = pneg %p2222_p2  ;;  %p1948_p10 = scmp.lt.s32.totalorder %s1939_s13, %s1939_s13 }
  0x1e   : > { %p1942_p7 = pnand %p1940_p3, %p1930_p0  ;;  %p1949_p12 = por %p1948_p10, %p1947_p9 }
  0x20   : > { %p1943_p8 = pneg %p1942_p7 }
  0x22   : > { %p1950_p1 = pnand %p1949_p12, %p1943_p8 }
  0x24   : > { %1953 = shalt.err (!%p1950_p1)
}
  0x25   : > { %s2112_s14 = smov 128   ;;  %s2113_s15 = smov 8  }
  0x26   : > { %1792 = dma.hbm_to_vmem [thread:$0]  (!%p2222_p2), %s2902_s2, 8192, %s184_s9, [#allocation6], %s2112_s14, %s2112_s14, %s2113_s15  }
  0x27   : > { %s1965_s23 = scalar_lea.vmem %s197_s12, 8192  ;;  %p1973_p11 = scmp.lt.s32.totalorder %s197_s12, %s197_s12 }
  0x28   : > { %p1966_p4 = scmp.ne.s32.totalorder %s197_s12, %s1965_s23  ;;  %p1974_p6 = scmp.lt.s32.totalorder %s1965_s23, %s1965_s23 }
  0x2a   : > { %p1968_p3 = pnand %p1966_p4, %p1930_p0  ;;  %p1975_p9 = por %p1974_p6, %p1973_p11 }
  0x2c   : > { %p1969_p7 = pneg %p1968_p3 }
  0x2e   : > { %p1976_p12 = pnand %p1975_p9, %p1969_p7 }
  0x30   : > { %1979 = shalt.err (!%p1976_p12)
}
  0x31   : > { %1795 = dma.hbm_to_vmem [thread:$0]  (!%p2222_p2), %s2903_s3, 8192, %s197_s12, [#allocation9], %s2112_s14, %s2112_s14, %s2113_s15  }
  0x32   : > { %p2908_p8 = scmp.ge.s32.totalorder %s2108_s21, 2 }
  0x34   : > { %209 = sbr.rel (%p2908_p8) target bundleno = 130 (0x82), region = 28 }
  0x39   : > { %212 = sbr.rel (!%p2193_p5) target bundleno = 96 (0x60), region = 32  ;;  %s213_s8 = sand.u32 (%p2193_p5), 1, %s2104_s20  }
  0x3a   : > { %s218_s9 = smul.u32 (%p2193_p5), 20, %s2108_s21  ;;  %s2254_s14 = scalar_lea.sflag (%p2193_p5), [#allocation3], %s213_s8 }
  0x3b   : > { %s1774_s11 = smul.u32 (%p2193_p5), 320, %s213_s8 }
  0x3c   : > { %s219_s13 = ssub.s32 (%p2193_p5), 38, %s218_s9 }
  0x3d   : > { %p220_p4 = scmp.lt.s32.totalorder (%p2193_p5), %s219_s13, 20  ;;  %s217_s15 = scalar_lea.vmem (%p2193_p5), [#allocation2], %s1774_s11 }
  0x3f   : > { %s2930_s13 = smov (!%p220_p4, %s219_s13), 20 }
  0x40   : > { %s2251_s10 = sshll.u32 %s2930_s13, 8 }
  0x41   : > { %s225_s12 = ssub.s32 5120, %s2251_s10 }
  0x42   : > { %226 = vsyncadd %s2254_s14, %s225_s12  ;;  %p1742_p6 = scmp.ne.s32.totalorder %s2251_s10, 0  ;;  %s1772_s16 = smul.u32 5120, %s2108_s21 }
  0x43   : > { %s232_s17 = sshll.u32 %s217_s15, 4  ;;  %s2916_s0 = sld [smem:[#allocation16_spill]]  ;;  %s2264_s17 = int_to_ptr.vmem [resolvable:$true] %s232_s17 }
  0x49   : > { %s2262_s26 = scalar_lea.hbm %s2916_s0, %s1772_s16  ;;  %s1984_s13 = scalar_lea.hbm %s2916_s0, 9728 }
  0x4a   : > { %s1980_s8 = scalar_lea.hbm %s2262_s26, %s2251_s10  ;;  %p1985_p10 = scmp.lt.s32.totalorder %s2262_s26, %s2916_s0 }
  0x4b   : > { %p1981_p11 = scmp.ne.s32.totalorder %s2262_s26, %s1980_s8  ;;  %p1986_p1 = scmp.lt.s32.totalorder %s1984_s13, %s1980_s8 }
  0x4d   : > { %p1982_p2 = pnand %p1981_p11, %p1742_p6  ;;  %p1987_p3 = por %p1986_p1, %p1985_p10 }
  0x4f   : > { %p1983_p0 = pneg %p1982_p2 }
  0x51   : > { %p1988_p7 = pnand %p1987_p3, %p1983_p0 }
  0x53   : > { %1991 = shalt.err (!%p1988_p7)
}
  0x54   : > { %s1992_s16 = scalar_lea.vmem %s2264_s17, %s2251_s10  ;;  %s2114_s23 = smov [#allocation2]  }
  0x55   : > { %p1993_p9 = scmp.ne.s32.totalorder %s2264_s17, %s1992_s16  ;;  %s1996_s25 = sshll.u32 %s2114_s23, 4  ;;  %s1997_s25 = int_to_ptr.vmem [resolvable:$false] %s1996_s25 }
  0x56   : > { %s1998_s9 = scalar_lea.vmem %s1997_s25, 10240  ;;  %p1999_p11 = scmp.lt.s32.totalorder %s2264_s17, %s1997_s25 }
  0x57   : > { %p1994_p12 = pnand %p1993_p9, %p1742_p6  ;;  %p2000_p2 = scmp.lt.s32.totalorder %s1998_s9, %s1992_s16 }
  0x59   : > { %p1995_p4 = pneg %p1994_p12  ;;  %p2001_p8 = por %p2000_p2, %p1999_p11 }
  0x5b   : > { %p2002_p10 = pnand %p2001_p8, %p1995_p4 }
  0x5d   : > { %2005 = shalt.err (!%p2002_p10)
}
  0x5e   : > { %s2115_s8 = smov 256   ;;  %s2116_s11 = smov 16  }
  0x5f   : > { %238 = dma.hbm_to_vmem [thread:$0]  (%p1742_p6), %s2262_s26, %s2251_s10, %s2264_s17, %s2254_s14, %s2115_s8, %s2115_s8, %s2116_s11  }
  0x60 PF: > { %241 = sbr.rel (!%p2193_p5) target bundleno = 130 (0x82), region = 36  ;;  %s242_s13 = sand.u32 (%p2193_p5), 1, %s2108_s21  }
  0x61   : > { %s244_s12 = sand.u32 (%p2193_p5), 1, %s2104_s20   ;;  %s247_s16 = smul.u32 (%p2193_p5), 20, %s2108_s21 }
  0x62   : > { %s1775_s15 = smul.u32 (%p2193_p5), 320, %s244_s12  ;;  %s2298_s0 = scalar_lea.sflag (%p2193_p5), [#allocation6], %s242_s13 }
  0x63   : > { %s248_s23 = ssub.s32 (%p2193_p5), 38, %s247_s16 }
  0x64   : > { %p249_p8 = scmp.lt.s32.totalorder (%p2193_p5), %s248_s23, 20  ;;  %s246_s10 = scalar_lea.vmem (%p2193_p5), [#allocation5], %s1775_s15 }
  0x66   : > { %s2932_s23 = smov (!%p249_p8, %s248_s23), 20 }
  0x67   : > { %s2295_s25 = sshll.u32 %s2932_s23, 8 }
  0x68   : > { %s254_s9 = ssub.s32 5120, %s2295_s25 }
  0x69   : > { %255 = vsyncadd %s2298_s0, %s254_s9  ;;  %p1749_p5 = scmp.ne.s32.totalorder %s2295_s25, 0  ;;  %s1773_s28 = smul.u32 5120, %s2108_s21 }
  0x6a   : > { %s261_s14 = sshll.u32 %s246_s10, 4  ;;  %s2010_s15 = scalar_lea.hbm %s2901_s1, 9728  ;;  %s2308_s14 = int_to_ptr.vmem [resolvable:$true] %s261_s14 }
  0x6b   : > { %s2306_s8 = scalar_lea.hbm %s2901_s1, %s1773_s28 }
  0x6c   : > { %s2006_s11 = scalar_lea.hbm %s2306_s8, %s2295_s25  ;;  %p2011_p3 = scmp.lt.s32.totalorder %s2306_s8, %s2901_s1 }
  0x6d   : > { %p2007_p6 = scmp.ne.s32.totalorder %s2306_s8, %s2006_s11  ;;  %p2012_p7 = scmp.lt.s32.totalorder %s2010_s15, %s2006_s11 }
  0x6f   : > { %p2008_p0 = pnand %p2007_p6, %p1749_p5  ;;  %p2013_p9 = por %p2012_p7, %p2011_p3 }
  0x71   : > { %p2009_p1 = pneg %p2008_p0 }
  0x73   : > { %p2014_p12 = pnand %p2013_p9, %p2009_p1 }
  0x75   : > { %2017 = shalt.err (!%p2014_p12)
}
  0x76   : > { %s2018_s9 = scalar_lea.vmem %s2308_s14, %s2295_s25  ;;  %s2117_s10 = smov [#allocation5]  }
  0x77   : > { %p2019_p4 = scmp.ne.s32.totalorder %s2308_s14, %s2018_s9  ;;  %s2022_s28 = sshll.u32 %s2117_s10, 4  ;;  %s2023_s28 = int_to_ptr.vmem [resolvable:$false] %s2022_s28 }
  0x78   : > { %s2024_s17 = scalar_lea.vmem %s2023_s28, 10240  ;;  %p2025_p10 = scmp.lt.s32.totalorder %s2308_s14, %s2023_s28 }
  0x79   : > { %p2020_p11 = pnand %p2019_p4, %p1749_p5  ;;  %p2026_p8 = scmp.lt.s32.totalorder %s2024_s17, %s2018_s9 }
  0x7b   : > { %p2021_p2 = pneg %p2020_p11  ;;  %p2027_p6 = por %p2026_p8, %p2025_p10 }
  0x7d   : > { %p2028_p0 = pnand %p2027_p6, %p2021_p2 }
  0x7f   : > { %2031 = shalt.err (!%p2028_p0)
}
  0x80   : > { %s2118_s26 = smov 256   ;;  %s2119_s11 = smov 16  }
  0x81   : > { %267 = dma.hbm_to_vmem [thread:$0]  (%p1749_p5), %s2306_s8, %s2295_s25, %s2308_s14, %s2298_s0, %s2118_s26, %s2118_s26, %s2119_s11  }
  0x82 PF: > { %273 = sbr.rel (%p2214_p13) target bundleno = 928 (0x3a0), region = 40  ;;  %s2337_s13 = sand.u32 (!%p2214_p13), 1, %s2100_s19  }
  0x83   : > { %s1776_s12 = smul.u32 (!%p2214_p13), 320, %s2337_s13  ;;  %s276_s15 = scalar_lea.sflag (!%p2214_p13), [#allocation3], %s2337_s13 }
  0x84   : > { %p2917_p1 = scmp.ne.s32.totalorder (!%p2214_p13), %s2911_s29, 0 }
  0x85   : > { %s2341_s16 = scalar_lea.vmem (!%p2214_p13), [#allocation2], %s1776_s12 }
  0x87   : > { %2075 = dma.done.wait (%p2917_p1), %s276_s15, 5120  }
  0x88   : > { %2077 = vsyncadd (%p2917_p1), %s276_s15, 4294962176  ;;  %s284_s0 = sand.u32 1, %s2175_s22   ;;  %s2348_s25 = scalar_lea.vmem [#allocation5], %s1776_s12 }
  0x89   : > { %s285_s7 = scalar_lea.sflag [#allocation6], %s284_s0 }
  0x8a   : > { %2079 = dma.done.wait (%p2917_p1), %s285_s7, 5120  }
  0x8b   : > { %2081 = vsyncadd (%p2917_p1), %s285_s7, 4294962176  ;;  %p2918_p13 = scmp.eq.s32.totalorder %s2175_s22, 0 }
  0x8d   : > { %2083 = dma.done.wait (%p2918_p13), [#allocation6], 8192   ;;  %p2919_p5 = pmov %p2918_p13 }
  0x8f   : > { %2085 = vsyncadd (%p2919_p5), [#allocation6], 4294959104  ;;  %p2920_p3 = pmov %p2919_p5 }
  0x91   : > { %2087 = dma.done.wait (%p2920_p3), [#allocation9], 8192   ;;  %p2921_p7 = pmov %p2920_p3 }
  0x92   : > { %v2120_v0 = vmov 0.0   ;;  %v664_v1 = vld [vmem:[#allocation8 + $0x78] sm:$0xff]  ;;  %v663_v3 = vld [vmem:[#allocation8 + $0x70] sm:$0xff]  ;;  %v662_v5 = vld [vmem:[#allocation8 + $0x68] sm:$0xff]  ;;  %s1777_s8 = smul.u32 160, %s2337_s13  ;;  %s1601_s9 = scalar_lea.sflag [#allocation4], %s2337_s13 }
  0x93   : > { %2089 = vsyncadd (%p2921_p7), [#allocation9], 4294959104  ;;  %713 = vmatprep.subr.mxu0 %v2120_v0  ;;  %878 = vmatprep.subr.mxu1 %v2120_v0  ;;  %v696_v2 = vld [vmem:[#allocation8 + $0x178] sm:$0xff]  ;;  %v695_v4 = vld [vmem:[#allocation8 + $0x170] sm:$0xff]  ;;  %p2922_p9 = scmp.ne.s32.totalorder %s2912_s30, 0 }
  0x94   : > { %714 = vmatpush1.msra.mxu0 %v664_v1  ;;  %879 = vmatpush1.msra.mxu1 %v696_v2  ;;  %v694_v6 = vld [vmem:[#allocation8 + $0x168] sm:$0xff]  ;;  %v661_v7 = vld [vmem:[#allocation8 + $0x60] sm:$0xff]  ;;  %v660_v9 = vld [vmem:[#allocation8 + $0x58] sm:$0xff]  ;;  %s2797_s23 = scalar_lea.vmem [#allocation10], %s1777_s8  ;;  %s1608_s10 = smul.u32 (%p2922_p9), 20, %s2175_s22 }
  0x95   : > { %715 = vmatprep.subr.mxu0 %v2120_v0  ;;  %880 = vmatprep.subr.mxu1 %v2120_v0  ;;  %v693_v8 = vld [vmem:[#allocation8 + $0x160] sm:$0xff]  ;;  %v692_v10 = vld [vmem:[#allocation8 + $0x158] sm:$0xff]  ;;  %v659_v11 = vld [vmem:[#allocation8 + $0x50] sm:$0xff] }
  0x96   : > { %716 = vmatpush1.msra.mxu0 %v663_v3  ;;  %881 = vmatpush1.msra.mxu1 %v695_v4  ;;  %v691_v12 = vld [vmem:[#allocation8 + $0x150] sm:$0xff]  ;;  %v658_v13 = vld [vmem:[#allocation8 + $0x48] sm:$0xff]  ;;  %v657_v15 = vld [vmem:[#allocation8 + $0x40] sm:$0xff]  ;;  %s1609_s28 = ssub.s32 (%p2922_p9), 38, %s1608_s10 }
  0x97   : > { %717 = vmatprep.subr.mxu0 %v2120_v0  ;;  %882 = vmatprep.subr.mxu1 %v2120_v0  ;;  %v690_v14 = vld [vmem:[#allocation8 + $0x148] sm:$0xff]  ;;  %v689_v16 = vld [vmem:[#allocation8 + $0x140] sm:$0xff]  ;;  %v656_v17 = vld [vmem:[#allocation8 + $0x38] sm:$0xff]  ;;  %p1610_p12 = scmp.lt.s32.totalorder (%p2922_p9), %s1609_s28, 20 }
  0x98   : > { %718 = vmatpush1.msra.mxu0 %v662_v5  ;;  %883 = vmatpush1.msra.mxu1 %v694_v6  ;;  %v688_v18 = vld [vmem:[#allocation8 + $0x138] sm:$0xff]  ;;  %v655_v19 = vld [vmem:[#allocation8 + $0x30] sm:$0xff]  ;;  %v654_v21 = vld [vmem:[#allocation8 + $0x28] sm:$0xff] }
  0x99   : > { %719 = vmatprep.subr.mxu0 %v2120_v0  ;;  %884 = vmatprep.subr.mxu1 %v2120_v0  ;;  %v687_v20 = vld [vmem:[#allocation8 + $0x130] sm:$0xff]  ;;  %v686_v22 = vld [vmem:[#allocation8 + $0x128] sm:$0xff]  ;;  %v653_v23 = vld [vmem:[#allocation8 + $0x20] sm:$0xff] }
  0x9a   : > { %720 = vmatpush1.msra.mxu0 %v661_v7  ;;  %885 = vmatpush1.msra.mxu1 %v693_v8  ;;  %v685_v24 = vld [vmem:[#allocation8 + $0x120] sm:$0xff]  ;;  %v652_v25 = vld [vmem:[#allocation8 + $0x18] sm:$0xff]  ;;  %v651_v27 = vld [vmem:[#allocation8 + $0x10] sm:$0xff] }
  0x9b   : > { %721 = vmatprep.subr.mxu0 %v2120_v0  ;;  %886 = vmatprep.subr.mxu1 %v2120_v0  ;;  %v684_v26 = vld [vmem:[#allocation8 + $0x118] sm:$0xff]  ;;  %v683_v28 = vld [vmem:[#allocation8 + $0x110] sm:$0xff]  ;;  %v650_v29 = vld [vmem:[#allocation8 + $0x8] sm:$0xff] }
  0x9c   : > { %722 = vmatpush1.msra.mxu0 %v660_v9  ;;  %887 = vmatpush1.msra.mxu1 %v692_v10  ;;  %v682_v30 = vld [vmem:[#allocation8 + $0x108] sm:$0xff]  ;;  %v649_v31 = vld [vmem:[#allocation8] sm:$0xff]  ;;  %v680_v33 = vld [vmem:[#allocation8 + $0xf8] sm:$0xff] }
  0x9d   : > { %723 = vmatprep.subr.mxu0 %v2120_v0  ;;  %888 = vmatprep.subr.mxu1 %v2120_v0  ;;  %v681_v32 = vld [vmem:[#allocation8 + $0x100] sm:$0xff]  ;;  %v712_v34 = vld [vmem:[#allocation8 + $0x1f8] sm:$0xff]  ;;  %v679_v35 = vld [vmem:[#allocation8 + $0xf0] sm:$0xff] }
  0x9e   : > { %724 = vmatpush1.msra.mxu0 %v659_v11  ;;  %889 = vmatpush1.msra.mxu1 %v691_v12  ;;  %v711_v36 = vld [vmem:[#allocation8 + $0x1f0] sm:$0xff]  ;;  %v678_v37 = vld [vmem:[#allocation8 + $0xe8] sm:$0xff]  ;;  %v677_v39 = vld [vmem:[#allocation8 + $0xe0] sm:$0xff] }
  0x9f   : > { %725 = vmatprep.subr.mxu0 %v2120_v0  ;;  %890 = vmatprep.subr.mxu1 %v2120_v0  ;;  %v710_v38 = vld [vmem:[#allocation8 + $0x1e8] sm:$0xff]  ;;  %v709_v40 = vld [vmem:[#allocation8 + $0x1e0] sm:$0xff]  ;;  %v676_v41 = vld [vmem:[#allocation8 + $0xd8] sm:$0xff] }
  0xa0   : > { %726 = vmatpush1.msra.mxu0 %v658_v13  ;;  %891 = vmatpush1.msra.mxu1 %v690_v14  ;;  %v708_v42 = vld [vmem:[#allocation8 + $0x1d8] sm:$0xff]  ;;  %v675_v43 = vld [vmem:[#allocation8 + $0xd0] sm:$0xff]  ;;  %v674_v45 = vld [vmem:[#allocation8 + $0xc8] sm:$0xff] }
  0xa1   : > { %727 = vmatprep.subr.mxu0 %v2120_v0  ;;  %892 = vmatprep.subr.mxu1 %v2120_v0  ;;  %v707_v44 = vld [vmem:[#allocation8 + $0x1d0] sm:$0xff]  ;;  %v706_v46 = vld [vmem:[#allocation8 + $0x1c8] sm:$0xff]  ;;  %v673_v47 = vld [vmem:[#allocation8 + $0xc0] sm:$0xff] }
  0xa2   : > { %728 = vmatpush1.msra.mxu0 %v657_v15  ;;  %893 = vmatpush1.msra.mxu1 %v689_v16  ;;  %v705_v48 = vld [vmem:[#allocation8 + $0x1c0] sm:$0xff]  ;;  %v672_v49 = vld [vmem:[#allocation8 + $0xb8] sm:$0xff]  ;;  %v671_v51 = vld [vmem:[#allocation8 + $0xb0] sm:$0xff] }
  0xa3   : > { %729 = vmatprep.subr.mxu0 %v2120_v0  ;;  %894 = vmatprep.subr.mxu1 %v2120_v0  ;;  %v704_v50 = vld [vmem:[#allocation8 + $0x1b8] sm:$0xff]  ;;  %v703_v52 = vld [vmem:[#allocation8 + $0x1b0] sm:$0xff]  ;;  %v670_v53 = vld [vmem:[#allocation8 + $0xa8] sm:$0xff] }
  0xa4   : > { %730 = vmatpush1.msra.mxu0 %v656_v17  ;;  %895 = vmatpush1.msra.mxu1 %v688_v18  ;;  %v702_v54 = vld [vmem:[#allocation8 + $0x1a8] sm:$0xff]  ;;  %v669_v55 = vld [vmem:[#allocation8 + $0xa0] sm:$0xff]  ;;  %v668_v57 = vld [vmem:[#allocation8 + $0x98] sm:$0xff] }
  0xa5   : > { %731 = vmatprep.subr.mxu0 %v2120_v0  ;;  %896 = vmatprep.subr.mxu1 %v2120_v0  ;;  %v701_v56 = vld [vmem:[#allocation8 + $0x1a0] sm:$0xff]  ;;  %v700_v58 = vld [vmem:[#allocation8 + $0x198] sm:$0xff]  ;;  %v667_v60 = vld [vmem:[#allocation8 + $0x90] sm:$0xff] }
  0xa6   : > { %732 = vmatpush1.msra.mxu0 %v655_v19  ;;  %897 = vmatpush1.msra.mxu1 %v687_v20  ;;  %v385_v59 = vld [vmem:[%s2348_s25] sm:$0xff]  ;;  %v699_v61 = vld [vmem:[#allocation8 + $0x190] sm:$0xff]  ;;  %v666_v62 = vld [vmem:[#allocation8 + $0x88] sm:$0xff] }
  0xa7   : > { %733 = vmatprep.subr.mxu0 %v2120_v0  ;;  %898 = vmatprep.subr.mxu1 %v2120_v0  ;;  %v698_v63 = vld [vmem:[#allocation8 + $0x188] sm:$0xff]  ;;  %v506_v1 = vunpack.c.h.bf16 %v385_v59  ;;  %v665_v3 = vld [vmem:[#allocation8 + $0x80] sm:$0xff]  ;;  %v505_v4 = vunpack.c.l.bf16 %v385_v59  ;;  %v387_v5 = vld [vmem:[%s2348_s25 + $0x10] sm:$0xff] }
  0xa8   : > { %734 = vmatpush1.msra.mxu0 %v654_v21  ;;  %899 = vmatpush1.msra.mxu1 %v686_v22  ;;  %v386_v2 = vld [vmem:[%s2348_s25 + $0x8] sm:$0xff]  ;;  %v697_v6 = vld [vmem:[#allocation8 + $0x180] sm:$0xff]  ;;  %v388_v9 = vld [vmem:[%s2348_s25 + $0x18] sm:$0xff]  ;;  %v510_v11 = vunpack.c.h.bf16 %v387_v5  ;;  %v509_v13 = vunpack.c.l.bf16 %v387_v5 }
  0xa9   : > { %735 = vmatprep.subr.mxu0 %v2120_v0  ;;  %900 = vmatprep.subr.mxu1 %v2120_v0  ;;  %v508_v7 = vunpack.c.h.bf16 %v386_v2  ;;  %v507_v8 = vunpack.c.l.bf16 %v386_v2  ;;  %v600_v10 = vld [vmem:[#allocation7 + $0x78] sm:$0xff]  ;;  %v512_v14 = vunpack.c.h.bf16 %v388_v9  ;;  %v511_v15 = vunpack.c.l.bf16 %v388_v9  ;;  %v389_v16 = vld [vmem:[%s2348_s25 + $0x20] sm:$0xff]  ;;  %v599_v17 = vld [vmem:[#allocation7 + $0x70] sm:$0xff] }
  0xaa   : > { %736 = vmatpush1.msra.mxu0 %v653_v23  ;;  %901 = vmatpush1.msra.mxu1 %v685_v24  ;;  %v632_v12 = vld [vmem:[#allocation7 + $0x178] sm:$0xff]  ;;  %v390_v18 = vld [vmem:[%s2348_s25 + $0x28] sm:$0xff]  ;;  %v631_v20 = vld [vmem:[#allocation7 + $0x170] sm:$0xff]  ;;  %v514_v21 = vunpack.c.h.bf16 %v389_v16  ;;  %v513_v22 = vunpack.c.l.bf16 %v389_v16 }
  0xab   : > { %737 = vmatprep.subr.mxu0 %v2120_v0  ;;  %902 = vmatprep.subr.mxu1 %v2120_v0  ;;  %v598_v19 = vld [vmem:[#allocation7 + $0x68] sm:$0xff]  ;;  %v516_v23 = vunpack.c.h.bf16 %v390_v18  ;;  %v391_v24 = vld [vmem:[%s2348_s25 + $0x30] sm:$0xff] }
  0xac   : > { %738 = vmatpush1.msra.mxu0 %v652_v25  ;;  %903 = vmatpush1.msra.mxu1 %v684_v26  ;;  %v630_v25 = vld [vmem:[#allocation7 + $0x168] sm:$0xff]  ;;  %v515_v26 = vunpack.c.l.bf16 %v390_v18 }
  0xad   : > { %739 = vmatprep.subr.mxu0 %v2120_v0  ;;  %904 = vmatprep.subr.mxu1 %v2120_v0  ;;  %v590_v2 = vld [vmem:[#allocation7 + $0x28] sm:$0xff] }
  0xae   : > { %740 = vmatpush1.msra.mxu0 %v651_v27  ;;  %905 = vmatpush1.msra.mxu1 %v683_v28  ;;  %v597_v27 = vld [vmem:[#allocation7 + $0x60] sm:$0xff]  ;;  %v392_v28 = vld [vmem:[%s2348_s25 + $0x38] sm:$0xff] }
  0xaf   : > { %741 = vmatprep.subr.mxu0 %v2120_v0  ;;  %906 = vmatprep.subr.mxu1 %v2120_v0 }
  0xb0   : > { %742 = vmatpush1.msra.mxu0 %v650_v29  ;;  %907 = vmatpush1.msra.mxu1 %v682_v30  ;;  %v518_v29 = vunpack.c.h.bf16 %v391_v24  ;;  %v596_v30 = vld [vmem:[#allocation7 + $0x58] sm:$0xff] }
  0xb1   : > { %743 = vmatprep.subr.mxu0 %v2120_v0  ;;  %908 = vmatprep.subr.mxu1 %v2120_v0 }
  0xb2   : > { %744 = vmatpush1.msra.mxu0 %v649_v31  ;;  %909 = vmatpush1.msra.mxu1 %v681_v32  ;;  %v517_v31 = vunpack.c.l.bf16 %v391_v24  ;;  %v629_v32 = vld [vmem:[#allocation7 + $0x160] sm:$0xff] }
  0xb3   : > { %745 = vmatprep.subr.mxu0 %v2120_v0  ;;  %910 = vmatprep.subr.mxu1 %v2120_v0 }
  0xb4   : > { %746 = vmatpush2.msra.mxu0 %v680_v33  ;;  %911 = vmatpush2.msra.mxu1 %v712_v34  ;;  %v520_v33 = vunpack.c.h.bf16 %v392_v28  ;;  %v393_v34 = vld [vmem:[%s2348_s25 + $0x40] sm:$0xff] }
  0xb5   : > { %747 = vmatprep.subr.mxu0 %v2120_v0  ;;  %912 = vmatprep.subr.mxu1 %v2120_v0 }
  0xb6   : > { %748 = vmatpush2.msra.mxu0 %v679_v35  ;;  %913 = vmatpush2.msra.mxu1 %v711_v36  ;;  %v519_v35 = vunpack.c.l.bf16 %v392_v28  ;;  %v394_v36 = vld [vmem:[%s2348_s25 + $0x48] sm:$0xff]  ;;  %v619_v28 = vld [vmem:[#allocation7 + $0x110] sm:$0xff] }
  0xb7   : > { %749 = vmatprep.subr.mxu0 %v2120_v0  ;;  %914 = vmatprep.subr.mxu1 %v2120_v0 }
  0xb8   : > { %750 = vmatpush2.msra.mxu0 %v678_v37  ;;  %915 = vmatpush2.msra.mxu1 %v710_v38  ;;  %v628_v37 = vld [vmem:[#allocation7 + $0x158] sm:$0xff]  ;;  %v595_v38 = vld [vmem:[#allocation7 + $0x50] sm:$0xff] }
  0xb9   : > { %751 = vmatprep.subr.mxu0 %v2120_v0  ;;  %916 = vmatprep.subr.mxu1 %v2120_v0 }
  0xba   : > { %752 = vmatpush2.msra.mxu0 %v677_v39  ;;  %917 = vmatpush2.msra.mxu1 %v709_v40  ;;  %v522_v39 = vunpack.c.h.bf16 %v393_v34  ;;  %v521_v40 = vunpack.c.l.bf16 %v393_v34 }
  0xbb   : > { %753 = vmatprep.subr.mxu0 %v2120_v0  ;;  %918 = vmatprep.subr.mxu1 %v2120_v0 }
  0xbc   : > { %754 = vmatpush2.msra.mxu0 %v676_v41  ;;  %919 = vmatpush2.msra.mxu1 %v708_v42  ;;  %v524_v41 = vunpack.c.h.bf16 %v394_v36  ;;  %v395_v42 = vld [vmem:[%s2348_s25 + $0x50] sm:$0xff] }
  0xbd   : > { %755 = vmatprep.subr.mxu0 %v2120_v0  ;;  %920 = vmatprep.subr.mxu1 %v2120_v0 }
  0xbe   : > { %756 = vmatpush2.msra.mxu0 %v675_v43  ;;  %921 = vmatpush2.msra.mxu1 %v707_v44  ;;  %v594_v43 = vld [vmem:[#allocation7 + $0x48] sm:$0xff]  ;;  %v396_v44 = vld [vmem:[%s2348_s25 + $0x58] sm:$0xff] }
  0xbf   : > { %757 = vmatprep.subr.mxu0 %v2120_v0  ;;  %922 = vmatprep.subr.mxu1 %v2120_v0 }
  0xc0   : > { %758 = vmatpush2.msra.mxu0 %v674_v45  ;;  %923 = vmatpush2.msra.mxu1 %v706_v46  ;;  %v627_v45 = vld [vmem:[#allocation7 + $0x150] sm:$0xff]  ;;  %v523_v46 = vunpack.c.l.bf16 %v394_v36 }
  0xc1   : > { %759 = vmatprep.subr.mxu0 %v2120_v0  ;;  %924 = vmatprep.subr.mxu1 %v2120_v0 }
  0xc2   : > { %760 = vmatpush2.msra.mxu0 %v673_v47  ;;  %925 = vmatpush2.msra.mxu1 %v705_v48  ;;  %v526_v47 = vunpack.c.h.bf16 %v395_v42  ;;  %v626_v48 = vld [vmem:[#allocation7 + $0x148] sm:$0xff] }
  0xc3   : > { %761 = vmatprep.subr.mxu0 %v2120_v0  ;;  %926 = vmatprep.subr.mxu1 %v2120_v0 }
  0xc4   : > { %762 = vmatpush2.msra.mxu0 %v672_v49  ;;  %927 = vmatpush2.msra.mxu1 %v704_v50  ;;  %v528_v49 = vunpack.c.h.bf16 %v396_v44  ;;  %v593_v50 = vld [vmem:[#allocation7 + $0x40] sm:$0xff] }
  0xc5   : > { %763 = vmatprep.subr.mxu0 %v2120_v0  ;;  %928 = vmatprep.subr.mxu1 %v2120_v0 }
  0xc6   : > { %764 = vmatpush2.msra.mxu0 %v671_v51  ;;  %929 = vmatpush2.msra.mxu1 %v703_v52  ;;  %v525_v51 = vunpack.c.l.bf16 %v395_v42  ;;  %v397_v52 = vld [vmem:[%s2348_s25 + $0x60] sm:$0xff] }
  0xc7   : > { %765 = vmatprep.subr.mxu0 %v2120_v0  ;;  %930 = vmatprep.subr.mxu1 %v2120_v0  ;;  %v529_v59 = vunpack.c.l.bf16 %v397_v52 }
  0xc8   : > { %766 = vmatpush2.msra.mxu0 %v670_v53  ;;  %931 = vmatpush2.msra.mxu1 %v702_v54  ;;  %v527_v53 = vunpack.c.l.bf16 %v396_v44  ;;  %v398_v54 = vld [vmem:[%s2348_s25 + $0x68] sm:$0xff] }
  0xc9   : > { %767 = vmatprep.subr.mxu0 %v2120_v0  ;;  %932 = vmatprep.subr.mxu1 %v2120_v0 }
  0xca   : > { %768 = vmatpush2.msra.mxu0 %v669_v55  ;;  %933 = vmatpush2.msra.mxu1 %v701_v56  ;;  %v592_v55 = vld [vmem:[#allocation7 + $0x38] sm:$0xff]  ;;  %v625_v56 = vld [vmem:[#allocation7 + $0x140] sm:$0xff] }
  0xcb   : > { %769 = vmatprep.subr.mxu0 %v2120_v0  ;;  %934 = vmatprep.subr.mxu1 %v2120_v0 }
  0xcc   : > { %770 = vmatpush2.msra.mxu0 %v668_v57  ;;  %935 = vmatpush2.msra.mxu1 %v700_v58  ;;  %v530_v57 = vunpack.c.h.bf16 %v397_v52  ;;  %v624_v58 = vld [vmem:[#allocation7 + $0x138] sm:$0xff] }
  0xcd   : > { %771 = vmatprep.subr.mxu0 %v2120_v0  ;;  %936 = vmatprep.subr.mxu1 %v2120_v0 }
  0xce   : > { %772 = vmatpush2.msra.mxu0 %v667_v60  ;;  %937 = vmatpush2.msra.mxu1 %v699_v61  ;;  %v532_v60 = vunpack.c.h.bf16 %v398_v54  ;;  %v531_v61 = vunpack.c.l.bf16 %v398_v54  ;;  %v646_v54 = vld [vmem:[#allocation7 + $0x1e8] sm:$0xff] }
  0xcf   : > { %773 = vmatprep.subr.mxu0 %v2120_v0  ;;  %938 = vmatprep.subr.mxu1 %v2120_v0 }
  0xd0   : > { %774 = vmatpush2.msra.mxu0 %v666_v62  ;;  %939 = vmatpush2.msra.mxu1 %v698_v63  ;;  %v399_v62 = vld [vmem:[%s2348_s25 + $0x70] sm:$0xff] }
  0xd1   : > { %775 = vmatprep.subr.mxu0 %v2120_v0  ;;  %777 = vmatprep.mubr.f32.mxu0 %v506_v1  ;;  %v591_v63 = vld [vmem:[#allocation7 + $0x30] sm:$0xff]  ;;  %v400_v1 = vld [vmem:[%s2348_s25 + $0x78] sm:$0xff]  ;;  %v533_v5 = vunpack.c.l.bf16 %v399_v62 }
  0xd2   : > { %776 = vmatpush2.msra.mxu0 %v665_v3  ;;  %940 = vmatprep.subr.mxu1 %v2120_v0  ;;  %v623_v3 = vld [vmem:[#allocation7 + $0x130] sm:$0xff]  ;;  %v535_v9 = vunpack.c.l.bf16 %v400_v1 }
  0xd3   : > { %778 = vmatmul.mubr.f32.vlgmr.msra.gmra.mxu0 %v505_v4  ;;  %941 = vmatpush2.msra.mxu1 %v697_v6  ;;  %v534_v4 = vunpack.c.h.bf16 %v399_v62  ;;  %v536_v6 = vunpack.c.h.bf16 %v400_v1 }
  0xd4   : > { %942 = vmatprep.mubr.f32.mxu1 %v508_v7  ;;  %1043 = vmatprep.subr.mxu0 %v2120_v0  ;;  %v401_v7 = vld [vmem:[%s2348_s25 + $0x80] sm:$0xff] }
  0xd5   : > { %943 = vmatmul.mubr.f32.vlgmr.msra.gmra.mxu1 %v507_v8  ;;  %1044 = vmatpush1.msra.mxu0 %v600_v10  ;;  %v622_v8 = vld [vmem:[#allocation7 + $0x128] sm:$0xff]  ;;  %v589_v10 = vld [vmem:[#allocation7 + $0x20] sm:$0xff] }
  0xd6   : > { %1208 = vmatprep.subr.mxu1 %v2120_v0  ;;  %782 = vmatprep.mubr.f32.mxu0 %v510_v11  ;;  %v402_v11 = vld [vmem:[%s2348_s25 + $0x88] sm:$0xff] }
  0xd7   : > { %1045 = vmatprep.subr.mxu0 %v2120_v0  ;;  %1209 = vmatpush1.msra.mxu1 %v632_v12  ;;  %v538_v12 = vunpack.c.h.bf16 %v401_v7  ;;  %v540_v16 = vunpack.c.h.bf16 %v402_v11  ;;  %v539_v18 = vunpack.c.l.bf16 %v402_v11  ;;  %v643_v11 = vld [vmem:[#allocation7 + $0x1d0] sm:$0xff] }
  0xd8   : > { %783 = vmatmul.mubr.f32.gmra.mxu0 %v509_v13  ;;  %947 = vmatprep.mubr.f32.mxu1 %v512_v14  ;;  %v588_v13 = vld [vmem:[#allocation7 + $0x18] sm:$0xff]  ;;  %v537_v14 = vunpack.c.l.bf16 %v401_v7 }
  0xd9   : > { %1046 = vmatpush1.msra.mxu0 %v599_v17  ;;  %948 = vmatmul.mubr.f32.gmra.mxu1 %v511_v15  ;;  %v621_v15 = vld [vmem:[#allocation7 + $0x120] sm:$0xff]  ;;  %v403_v17 = vld [vmem:[%s2348_s25 + $0x90] sm:$0xff] }
  0xda   : > { %1047 = vmatprep.subr.mxu0 %v2120_v0  ;;  %1210 = vmatprep.subr.mxu1 %v2120_v0 }
  0xdb   : > { %1048 = vmatpush1.msra.mxu0 %v598_v19  ;;  %1211 = vmatpush1.msra.mxu1 %v631_v20  ;;  %v404_v19 = vld [vmem:[%s2348_s25 + $0x98] sm:$0xff] }
  0xdc   : > { %787 = vmatprep.mubr.f32.mxu0 %v514_v21  ;;  %1212 = vmatprep.subr.mxu1 %v2120_v0  ;;  %v620_v20 = vld [vmem:[#allocation7 + $0x118] sm:$0xff]  ;;  %v587_v21 = vld [vmem:[#allocation7 + $0x10] sm:$0xff]  ;;  %v544_v24 = vunpack.c.h.bf16 %v404_v19 }
  0xdd   : > { %788 = vmatmul.mubr.f32.gmra.mxu0 %v513_v22  ;;  %952 = vmatprep.mubr.f32.mxu1 %v516_v23  ;;  %v542_v22 = vunpack.c.h.bf16 %v403_v17  ;;  %v541_v23 = vunpack.c.l.bf16 %v403_v17 }
  0xde   : > { %1049 = vmatprep.subr.mxu0 %v2120_v0  ;;  %1213 = vmatpush1.msra.mxu1 %v630_v25  ;;  %v405_v25 = vld [vmem:[%s2348_s25 + $0xa0] sm:$0xff] }
  0xdf   : > { %953 = vmatmul.mubr.f32.gmra.mxu1 %v515_v26  ;;  %1050 = vmatpush1.msra.mxu0 %v597_v27  ;;  %v586_v26 = vld [vmem:[#allocation7 + $0x8] sm:$0xff]  ;;  %v545_v34 = vunpack.c.l.bf16 %v405_v25 }
  0xe0   : > { %1051 = vmatprep.subr.mxu0 %v2120_v0  ;;  %1214 = vmatprep.subr.mxu1 %v2120_v0  ;;  %v406_v27 = vld [vmem:[%s2348_s25 + $0xa8] sm:$0xff] }
  0xe1   : > { %792 = vmatprep.mubr.f32.mxu0 %v518_v29  ;;  %1052 = vmatpush1.msra.mxu0 %v596_v30  ;;  %v543_v29 = vunpack.c.l.bf16 %v404_v19  ;;  %v546_v30 = vunpack.c.h.bf16 %v405_v25  ;;  %v547_v36 = vunpack.c.l.bf16 %v406_v27 }
  0xe2   : > { %1215 = vmatpush1.msra.mxu1 %v629_v32  ;;  %793 = vmatmul.mubr.f32.gmra.mxu0 %v517_v31  ;;  %v618_v31 = vld [vmem:[#allocation7 + $0x108] sm:$0xff]  ;;  %v548_v32 = vunpack.c.h.bf16 %v406_v27 }
  0xe3   : > { %957 = vmatprep.mubr.f32.mxu1 %v520_v33  ;;  %1216 = vmatprep.subr.mxu1 %v2120_v0  ;;  %v585_v33 = vld [vmem:[#allocation7] sm:$0xff] }
  0xe4   : > { %958 = vmatmul.mubr.f32.gmra.mxu1 %v519_v35  ;;  %1053 = vmatprep.subr.mxu0 %v2120_v0  ;;  %v407_v35 = vld [vmem:[%s2348_s25 + $0xb0] sm:$0xff] }
  0xe5   : > { %1217 = vmatpush1.msra.mxu1 %v628_v37  ;;  %1054 = vmatpush1.msra.mxu0 %v595_v38  ;;  %v408_v37 = vld [vmem:[%s2348_s25 + $0xb8] sm:$0xff]  ;;  %v549_v42 = vunpack.c.l.bf16 %v407_v35 }
  0xe6   : > { %797 = vmatprep.mubr.f32.mxu0 %v522_v39  ;;  %1055 = vmatprep.subr.mxu0 %v2120_v0  ;;  %v616_v38 = vld [vmem:[#allocation7 + $0xf8] sm:$0xff]  ;;  %v617_v39 = vld [vmem:[#allocation7 + $0x100] sm:$0xff]  ;;  %v551_v44 = vunpack.c.l.bf16 %v408_v37 }
  0xe7   : > { %1218 = vmatprep.subr.mxu1 %v2120_v0  ;;  %798 = vmatmul.mubr.f32.gmra.mxu0 %v521_v40  ;;  %v550_v40 = vunpack.c.h.bf16 %v407_v35 }
  0xe8   : > { %962 = vmatprep.mubr.f32.mxu1 %v524_v41  ;;  %1056 = vmatpush1.msra.mxu0 %v594_v43  ;;  %v648_v41 = vld [vmem:[#allocation7 + $0x1f8] sm:$0xff]  ;;  %v552_v43 = vunpack.c.h.bf16 %v408_v37  ;;  %v638_v37 = vld [vmem:[#allocation7 + $0x1a8] sm:$0xff] }
  0xe9   : > { %1219 = vmatpush1.msra.mxu1 %v627_v45  ;;  %1057 = vmatprep.subr.mxu0 %v2120_v0  ;;  %v409_v45 = vld [vmem:[%s2348_s25 + $0xc0] sm:$0xff] }
  0xea   : > { %963 = vmatmul.mubr.f32.gmra.mxu1 %v523_v46  ;;  %1220 = vmatprep.subr.mxu1 %v2120_v0  ;;  %v615_v46 = vld [vmem:[#allocation7 + $0xf0] sm:$0xff] }
  0xeb   : > { %1221 = vmatpush1.msra.mxu1 %v626_v48  ;;  %802 = vmatprep.mubr.f32.mxu0 %v526_v47  ;;  %v410_v47 = vld [vmem:[%s2348_s25 + $0xc8] sm:$0xff] }
  0xec   : > { %1058 = vmatpush1.msra.mxu0 %v593_v50  ;;  %967 = vmatprep.mubr.f32.mxu1 %v528_v49  ;;  %v614_v48 = vld [vmem:[#allocation7 + $0xe8] sm:$0xff]  ;;  %v647_v49 = vld [vmem:[#allocation7 + $0x1f0] sm:$0xff]  ;;  %v554_v50 = vunpack.c.h.bf16 %v409_v45  ;;  %v556_v52 = vunpack.c.h.bf16 %v410_v47 }
  0xed   : > { %803 = vmatmul.mubr.f32.gmra.mxu0 %v525_v51  ;;  %1059 = vmatprep.subr.mxu0 %v2120_v0  ;;  %v553_v51 = vunpack.c.l.bf16 %v409_v45 }
  0xee   : > { %1222 = vmatprep.subr.mxu1 %v2120_v0  ;;  %968 = vmatmul.mubr.f32.gmra.mxu1 %v527_v53  ;;  %v411_v53 = vld [vmem:[%s2348_s25 + $0xd0] sm:$0xff] }
  0xef   : > { %1060 = vmatpush1.msra.mxu0 %v592_v55  ;;  %1223 = vmatpush1.msra.mxu1 %v625_v56  ;;  %v555_v55 = vunpack.c.l.bf16 %v410_v47  ;;  %v613_v56 = vld [vmem:[#allocation7 + $0xe0] sm:$0xff] }
  0xf0   : > { %1224 = vmatprep.subr.mxu1 %v2120_v0  ;;  %807 = vmatprep.mubr.f32.mxu0 %v530_v57  ;;  %v412_v57 = vld [vmem:[%s2348_s25 + $0xd8] sm:$0xff] }
  0xf1   : > { %1061 = vmatprep.subr.mxu0 %v2120_v0  ;;  %1225 = vmatpush1.msra.mxu1 %v624_v58  ;;  %v558_v58 = vunpack.c.h.bf16 %v411_v53  ;;  %v560_v62 = vunpack.c.h.bf16 %v412_v57  ;;  %v559_v1 = vunpack.c.l.bf16 %v412_v57 }
  0xf2   : > { %808 = vmatmul.mubr.f32.gmra.mxu0 %v529_v59  ;;  %972 = vmatprep.mubr.f32.mxu1 %v532_v60  ;;  %v612_v59 = vld [vmem:[#allocation7 + $0xd8] sm:$0xff]  ;;  %v557_v60 = vunpack.c.l.bf16 %v411_v53 }
  0xf3   : > { %1062 = vmatpush1.msra.mxu0 %v591_v63  ;;  %973 = vmatmul.mubr.f32.gmra.mxu1 %v531_v61  ;;  %v645_v61 = vld [vmem:[#allocation7 + $0x1e0] sm:$0xff] }
  0xf4   : > { %1063 = vmatprep.subr.mxu0 %v2120_v0  ;;  %1226 = vmatprep.subr.mxu1 %v2120_v0  ;;  %v413_v63 = vld [vmem:[%s2348_s25 + $0xe0] sm:$0xff] }
  0xf5   : > { %1064 = vmatpush1.msra.mxu0 %v590_v2  ;;  %1227 = vmatpush1.msra.mxu1 %v623_v3  ;;  %v414_v2 = vld [vmem:[%s2348_s25 + $0xe8] sm:$0xff]  ;;  %v644_v3 = vld [vmem:[#allocation7 + $0x1d8] sm:$0xff] }
  0xf6   : > { %812 = vmatprep.mubr.f32.mxu0 %v534_v4  ;;  %1228 = vmatprep.subr.mxu1 %v2120_v0  ;;  %v611_v4 = vld [vmem:[#allocation7 + $0xd0] sm:$0xff]  ;;  %v564_v7 = vunpack.c.h.bf16 %v414_v2 }
  0xf7   : > { %813 = vmatmul.mubr.f32.gmra.mxu0 %v533_v5  ;;  %977 = vmatprep.mubr.f32.mxu1 %v536_v6  ;;  %v562_v5 = vunpack.c.h.bf16 %v413_v63  ;;  %v561_v6 = vunpack.c.l.bf16 %v413_v63 }
  0xf8   : > { %1065 = vmatprep.subr.mxu0 %v2120_v0  ;;  %1229 = vmatpush1.msra.mxu1 %v622_v8  ;;  %v415_v8 = vld [vmem:[%s2348_s25 + $0xf0] sm:$0xff] }
  0xf9   : > { %978 = vmatmul.mubr.f32.gmra.mxu1 %v535_v9  ;;  %1066 = vmatpush1.msra.mxu0 %v589_v10  ;;  %v610_v9 = vld [vmem:[#allocation7 + $0xc8] sm:$0xff]  ;;  %v416_v10 = vld [vmem:[%s2348_s25 + $0xf8] sm:$0xff]  ;;  %v565_v17 = vunpack.c.l.bf16 %v415_v8 }
  0xfa   : > { %1067 = vmatprep.subr.mxu0 %v2120_v0  ;;  %1230 = vmatprep.subr.mxu1 %v2120_v0  ;;  %v567_v19 = vunpack.c.l.bf16 %v416_v10 }
  0xfb   : > { %817 = vmatprep.mubr.f32.mxu0 %v538_v12  ;;  %1068 = vmatpush1.msra.mxu0 %v588_v13  ;;  %v563_v12 = vunpack.c.l.bf16 %v414_v2  ;;  %v566_v13 = vunpack.c.h.bf16 %v415_v8  ;;  %v633_v2 = vld [vmem:[#allocation7 + $0x180] sm:$0xff] }
  0xfc   : > { %1231 = vmatpush1.msra.mxu1 %v621_v15  ;;  %818 = vmatmul.mubr.f32.gmra.mxu0 %v537_v14  ;;  %v642_v14 = vld [vmem:[#allocation7 + $0x1c8] sm:$0xff]  ;;  %v568_v15 = vunpack.c.h.bf16 %v416_v10 }
  0xfd   : > { %982 = vmatprep.mubr.f32.mxu1 %v540_v16  ;;  %1232 = vmatprep.subr.mxu1 %v2120_v0  ;;  %v609_v16 = vld [vmem:[#allocation7 + $0xc0] sm:$0xff] }
  0xfe   : > { %983 = vmatmul.mubr.f32.gmra.mxu1 %v539_v18  ;;  %1069 = vmatprep.subr.mxu0 %v2120_v0  ;;  %v417_v18 = vld [vmem:[%s2348_s25 + $0x100] sm:$0xff] }
  0xff   : > { %1233 = vmatpush1.msra.mxu1 %v620_v20  ;;  %1070 = vmatpush1.msra.mxu0 %v587_v21  ;;  %v418_v20 = vld [vmem:[%s2348_s25 + $0x108] sm:$0xff]  ;;  %v608_v21 = vld [vmem:[#allocation7 + $0xb8] sm:$0xff]  ;;  %v569_v25 = vunpack.c.l.bf16 %v417_v18 }
 0x100   : > { %822 = vmatprep.mubr.f32.mxu0 %v542_v22  ;;  %1071 = vmatprep.subr.mxu0 %v2120_v0  ;;  %v641_v22 = vld [vmem:[#allocation7 + $0x1c0] sm:$0xff]  ;;  %v571_v27 = vunpack.c.l.bf16 %v418_v20 }
 0x101   : > { %1234 = vmatprep.subr.mxu1 %v2120_v0  ;;  %823 = vmatmul.mubr.f32.gmra.mxu0 %v541_v23  ;;  %v570_v23 = vunpack.c.h.bf16 %v417_v18 }
 0x102   : > { %987 = vmatprep.mubr.f32.mxu1 %v544_v24  ;;  %1072 = vmatpush1.msra.mxu0 %v586_v26  ;;  %v640_v24 = vld [vmem:[#allocation7 + $0x1b8] sm:$0xff]  ;;  %v572_v26 = vunpack.c.h.bf16 %v418_v20  ;;  %v354_v20 = vld [vmem:[%s2341_s16 + $0x48] sm:$0xff] }
 0x103   : > { %1235 = vmatpush1.msra.mxu1 %v619_v28  ;;  %1073 = vmatprep.subr.mxu0 %v2120_v0  ;;  %v419_v28 = vld [vmem:[%s2348_s25 + $0x110] sm:$0xff] }
 0x104   : > { %988 = vmatmul.mubr.f32.gmra.mxu1 %v543_v29  ;;  %1236 = vmatprep.subr.mxu1 %v2120_v0  ;;  %v607_v29 = vld [vmem:[#allocation7 + $0xb0] sm:$0xff] }
 0x105   : > { %1237 = vmatpush1.msra.mxu1 %v618_v31  ;;  %827 = vmatprep.mubr.f32.mxu0 %v546_v30  ;;  %v420_v30 = vld [vmem:[%s2348_s25 + $0x118] sm:$0xff]  ;;  %v606_v31 = vld [vmem:[#allocation7 + $0xa8] sm:$0xff] }
 0x106   : > { %1074 = vmatpush1.msra.mxu0 %v585_v33  ;;  %992 = vmatprep.mubr.f32.mxu1 %v548_v32  ;;  %v639_v32 = vld [vmem:[#allocation7 + $0x1b0] sm:$0xff]  ;;  %v574_v33 = vunpack.c.h.bf16 %v419_v28  ;;  %v576_v35 = vunpack.c.h.bf16 %v420_v30 }
 0x107   : > { %828 = vmatmul.mubr.f32.gmra.mxu0 %v545_v34  ;;  %1075 = vmatprep.subr.mxu0 %v2120_v0  ;;  %v573_v34 = vunpack.c.l.bf16 %v419_v28  ;;  %v443_v28 = vunpack.c.l.bf16 %v354_v20 }
 0x108   : > { %1238 = vmatprep.subr.mxu1 %v2120_v0  ;;  %993 = vmatmul.mubr.f32.gmra.mxu1 %v547_v36  ;;  %v421_v36 = vld [vmem:[%s2348_s25 + $0x120] sm:$0xff] }
 0x109   : > { %1076 = vmatpush2.msra.mxu0 %v616_v38  ;;  %1239 = vmatpush1.msra.mxu1 %v617_v39  ;;  %v575_v38 = vunpack.c.l.bf16 %v420_v30  ;;  %v605_v39 = vld [vmem:[#allocation7 + $0xa0] sm:$0xff] }
 0x10a   : > { %1240 = vmatprep.subr.mxu1 %v2120_v0  ;;  %832 = vmatprep.mubr.f32.mxu0 %v550_v40  ;;  %v422_v40 = vld [vmem:[%s2348_s25 + $0x128] sm:$0xff] }
 0x10b   : > { %1077 = vmatprep.subr.mxu0 %v2120_v0  ;;  %1241 = vmatpush2.msra.mxu1 %v648_v41  ;;  %v578_v41 = vunpack.c.h.bf16 %v421_v36  ;;  %v580_v45 = vunpack.c.h.bf16 %v422_v40  ;;  %v579_v47 = vunpack.c.l.bf16 %v422_v40 }
 0x10c   : > { %833 = vmatmul.mubr.f32.gmra.mxu0 %v549_v42  ;;  %997 = vmatprep.mubr.f32.mxu1 %v552_v43  ;;  %v604_v42 = vld [vmem:[#allocation7 + $0x98] sm:$0xff]  ;;  %v577_v43 = vunpack.c.l.bf16 %v421_v36 }
 0x10d   : > { %1078 = vmatpush2.msra.mxu0 %v615_v46  ;;  %998 = vmatmul.mubr.f32.gmra.mxu1 %v551_v44  ;;  %v637_v44 = vld [vmem:[#allocation7 + $0x1a0] sm:$0xff]  ;;  %v423_v46 = vld [vmem:[%s2348_s25 + $0x130] sm:$0xff] }
 0x10e   : > { %1079 = vmatprep.subr.mxu0 %v2120_v0  ;;  %1242 = vmatprep.subr.mxu1 %v2120_v0 }
 0x10f   : > { %1080 = vmatpush2.msra.mxu0 %v614_v48  ;;  %1243 = vmatpush2.msra.mxu1 %v647_v49  ;;  %v424_v48 = vld [vmem:[%s2348_s25 + $0x138] sm:$0xff] }
 0x110   : > { %837 = vmatprep.mubr.f32.mxu0 %v554_v50  ;;  %1244 = vmatprep.subr.mxu1 %v2120_v0  ;;  %v636_v49 = vld [vmem:[#allocation7 + $0x198] sm:$0xff]  ;;  %v603_v50 = vld [vmem:[#allocation7 + $0x90] sm:$0xff]  ;;  %v584_v53 = vunpack.c.h.bf16 %v424_v48  ;;  %v583_v57 = vunpack.c.l.bf16 %v424_v48 }
 0x111   : > { %838 = vmatmul.mubr.f32.gmra.mxu0 %v553_v51  ;;  %1002 = vmatprep.mubr.f32.mxu1 %v556_v52  ;;  %v582_v51 = vunpack.c.h.bf16 %v423_v46  ;;  %v581_v52 = vunpack.c.l.bf16 %v423_v46 }
 0x112   : > { %1081 = vmatprep.subr.mxu0 %v2120_v0  ;;  %1245 = vmatpush2.msra.mxu1 %v646_v54  ;;  %v602_v54 = vld [vmem:[#allocation7 + $0x88] sm:$0xff] }
 0x113   : > { %1003 = vmatmul.mubr.f32.gmra.mxu1 %v555_v55  ;;  %1082 = vmatpush2.msra.mxu0 %v613_v56  ;;  %v345_v55 = vld [vmem:[%s2341_s16] sm:$0xff]  ;;  %v635_v56 = vld [vmem:[#allocation7 + $0x190] sm:$0xff] }
 0x114   : > { %1083 = vmatprep.subr.mxu0 %v2120_v0  ;;  %1246 = vmatprep.subr.mxu1 %v2120_v0  ;;  %v425_v63 = vunpack.c.l.bf16 %v345_v55 }
 0x115   : > { %842 = vmatprep.mubr.f32.mxu0 %v558_v58  ;;  %1084 = vmatpush2.msra.mxu0 %v612_v59  ;;  %v346_v58 = vld [vmem:[%s2341_s16 + $0x8] sm:$0xff]  ;;  %v347_v59 = vld [vmem:[%s2341_s16 + $0x10] sm:$0xff] }
 0x116   : > { %1247 = vmatpush2.msra.mxu1 %v645_v61  ;;  %843 = vmatmul.mubr.f32.gmra.mxu0 %v557_v60  ;;  %v634_v60 = vld [vmem:[#allocation7 + $0x188] sm:$0xff]  ;;  %v601_v61 = vld [vmem:[#allocation7 + $0x80] sm:$0xff]  ;;  %v429_v8 = vunpack.c.l.bf16 %v347_v59 }
 0x117   : > { %1007 = vmatprep.mubr.f32.mxu1 %v560_v62  ;;  %1248 = vmatprep.subr.mxu1 %v2120_v0  ;;  %v426_v62 = vunpack.c.h.bf16 %v345_v55 }
 0x118   : > { %1008 = vmatmul.mubr.f32.gmra.mxu1 %v559_v1  ;;  %1085 = vmatprep.subr.mxu0 %v2120_v0  ;;  %v348_v1 = vld [vmem:[%s2341_s16 + $0x18] sm:$0xff] }
 0x119   : > { %1249 = vmatpush2.msra.mxu1 %v644_v3  ;;  %1086 = vmatpush2.msra.mxu0 %v611_v4  ;;  %v428_v3 = vunpack.c.h.bf16 %v346_v58  ;;  %v430_v4 = vunpack.c.h.bf16 %v347_v59  ;;  %v367_v59 = vld [vmem:[%s2341_s16 + $0xb0] sm:$0xff] }
 0x11a   : > { %847 = vmatprep.mubr.f32.mxu0 %v562_v5  ;;  %1087 = vmatprep.subr.mxu0 %v2120_v0  ;;  %v427_v5 = vunpack.c.l.bf16 %v346_v58 }
 0x11b   : > { %1250 = vmatprep.subr.mxu1 %v2120_v0  ;;  %848 = vmatmul.mubr.f32.gmra.mxu0 %v561_v6  ;;  %v349_v6 = vld [vmem:[%s2341_s16 + $0x20] sm:$0xff] }
 0x11c   : > { %1012 = vmatprep.mubr.f32.mxu1 %v564_v7  ;;  %1088 = vmatpush2.msra.mxu0 %v610_v9  ;;  %v432_v7 = vunpack.c.h.bf16 %v348_v1  ;;  %v350_v9 = vld [vmem:[%s2341_s16 + $0x28] sm:$0xff]  ;;  %v434_v10 = vunpack.c.h.bf16 %v349_v6 }
 0x11d   : > { %1251 = vmatpush2.msra.mxu1 %v643_v11  ;;  %1089 = vmatprep.subr.mxu0 %v2120_v0  ;;  %v431_v11 = vunpack.c.l.bf16 %v348_v1 }
 0x11e   : > { %1013 = vmatmul.mubr.f32.gmra.mxu1 %v563_v12  ;;  %1252 = vmatprep.subr.mxu1 %v2120_v0  ;;  %v351_v12 = vld [vmem:[%s2341_s16 + $0x30] sm:$0xff] }
 0x11f   : > { %1253 = vmatpush2.msra.mxu1 %v642_v14  ;;  %852 = vmatprep.mubr.f32.mxu0 %v566_v13  ;;  %v436_v13 = vunpack.c.h.bf16 %v350_v9  ;;  %v433_v14 = vunpack.c.l.bf16 %v349_v6 }
 0x120   : > { %1090 = vmatpush2.msra.mxu0 %v609_v16  ;;  %1017 = vmatprep.mubr.f32.mxu1 %v568_v15  ;;  %v438_v15 = vunpack.c.h.bf16 %v351_v12  ;;  %v435_v16 = vunpack.c.l.bf16 %v350_v9 }
 0x121   : > { %853 = vmatmul.mubr.f32.gmra.mxu0 %v565_v17  ;;  %1091 = vmatprep.subr.mxu0 %v2120_v0  ;;  %v353_v17 = vld [vmem:[%s2341_s16 + $0x40] sm:$0xff] }
 0x122   : > { %1254 = vmatprep.subr.mxu1 %v2120_v0  ;;  %1018 = vmatmul.mubr.f32.gmra.mxu1 %v567_v19  ;;  %v437_v19 = vunpack.c.l.bf16 %v351_v12 }
 0x123   : > { %1092 = vmatpush2.msra.mxu0 %v608_v21  ;;  %1255 = vmatpush2.msra.mxu1 %v641_v22  ;;  %v442_v21 = vunpack.c.h.bf16 %v353_v17 }
 0x124   : > { %1256 = vmatprep.subr.mxu1 %v2120_v0  ;;  %857 = vmatprep.mubr.f32.mxu0 %v570_v23  ;;  %v355_v23 = vld [vmem:[%s2341_s16 + $0x50] sm:$0xff] }
 0x125   : > { %1093 = vmatprep.subr.mxu0 %v2120_v0  ;;  %1257 = vmatpush2.msra.mxu1 %v640_v24  ;;  %v444_v24 = vunpack.c.h.bf16 %v354_v20 }
 0x126   : > { %858 = vmatmul.mubr.f32.gmra.mxu0 %v569_v25  ;;  %1022 = vmatprep.mubr.f32.mxu1 %v572_v26  ;;  %v441_v25 = vunpack.c.l.bf16 %v353_v17  ;;  %v356_v26 = vld [vmem:[%s2341_s16 + $0x58] sm:$0xff] }
 0x127   : > { %1094 = vmatpush2.msra.mxu0 %v607_v29  ;;  %1023 = vmatmul.mubr.f32.gmra.mxu1 %v571_v27  ;;  %v446_v27 = vunpack.c.h.bf16 %v355_v23  ;;  %v357_v29 = vld [vmem:[%s2341_s16 + $0x60] sm:$0xff]  ;;  %v448_v30 = vunpack.c.h.bf16 %v356_v26 }
 0x128   : > { %1095 = vmatprep.subr.mxu0 %v2120_v0  ;;  %1258 = vmatprep.subr.mxu1 %v2120_v0 }
 0x129   : > { %1096 = vmatpush2.msra.mxu0 %v606_v31  ;;  %1259 = vmatpush2.msra.mxu1 %v639_v32  ;;  %v445_v31 = vunpack.c.l.bf16 %v355_v23  ;;  %v358_v32 = vld [vmem:[%s2341_s16 + $0x68] sm:$0xff] }
 0x12a   : > { %862 = vmatprep.mubr.f32.mxu0 %v574_v33  ;;  %1260 = vmatprep.subr.mxu1 %v2120_v0  ;;  %v450_v33 = vunpack.c.h.bf16 %v357_v29  ;;  %v452_v36 = vunpack.c.h.bf16 %v358_v32  ;;  %v451_v40 = vunpack.c.l.bf16 %v358_v32 }
 0x12b   : > { %863 = vmatmul.mubr.f32.gmra.mxu0 %v573_v34  ;;  %1027 = vmatprep.mubr.f32.mxu1 %v576_v35  ;;  %v447_v34 = vunpack.c.l.bf16 %v356_v26  ;;  %v359_v35 = vld [vmem:[%s2341_s16 + $0x70] sm:$0xff] }
 0x12c   : > { %1097 = vmatprep.subr.mxu0 %v2120_v0  ;;  %1261 = vmatpush2.msra.mxu1 %v638_v37  ;;  %v449_v37 = vunpack.c.l.bf16 %v357_v29 }
 0x12d   : > { %1028 = vmatmul.mubr.f32.gmra.mxu1 %v575_v38  ;;  %1098 = vmatpush2.msra.mxu0 %v605_v39  ;;  %v360_v38 = vld [vmem:[%s2341_s16 + $0x78] sm:$0xff]  ;;  %v454_v39 = vunpack.c.h.bf16 %v359_v35 }
 0x12e   : > { %1099 = vmatprep.subr.mxu0 %v2120_v0  ;;  %1262 = vmatprep.subr.mxu1 %v2120_v0  ;;  %v455_v46 = vunpack.c.l.bf16 %v360_v38 }
 0x12f   : > { %867 = vmatprep.mubr.f32.mxu0 %v578_v41  ;;  %1100 = vmatpush2.msra.mxu0 %v604_v42  ;;  %v361_v41 = vld [vmem:[%s2341_s16 + $0x80] sm:$0xff]  ;;  %v456_v42 = vunpack.c.h.bf16 %v360_v38 }
 0x130   : > { %1263 = vmatpush2.msra.mxu1 %v637_v44  ;;  %868 = vmatmul.mubr.f32.gmra.mxu0 %v577_v43  ;;  %v453_v43 = vunpack.c.l.bf16 %v359_v35  ;;  %v362_v44 = vld [vmem:[%s2341_s16 + $0x88] sm:$0xff] }
 0x131   : > { %1032 = vmatprep.mubr.f32.mxu1 %v580_v45  ;;  %1264 = vmatprep.subr.mxu1 %v2120_v0  ;;  %v458_v45 = vunpack.c.h.bf16 %v361_v41  ;;  %v460_v48 = vunpack.c.h.bf16 %v362_v44 }
 0x132   : > { %1033 = vmatmul.mubr.f32.gmra.mxu1 %v579_v47  ;;  %1101 = vmatprep.subr.mxu0 %v2120_v0  ;;  %v363_v47 = vld [vmem:[%s2341_s16 + $0x90] sm:$0xff] }
 0x133   : > { %1265 = vmatpush2.msra.mxu1 %v636_v49  ;;  %1102 = vmatpush2.msra.mxu0 %v603_v50  ;;  %v457_v49 = vunpack.c.l.bf16 %v361_v41  ;;  %v364_v50 = vld [vmem:[%s2341_s16 + $0x98] sm:$0xff]  ;;  %v461_v55 = vunpack.c.l.bf16 %v363_v47 }
 0x134   : > { %872 = vmatprep.mubr.f32.mxu0 %v582_v51  ;;  %1103 = vmatprep.subr.mxu0 %v2120_v0  ;;  %v462_v51 = vunpack.c.h.bf16 %v363_v47  ;;  %v463_v58 = vunpack.c.l.bf16 %v364_v50 }
 0x135   : > { %1266 = vmatprep.subr.mxu1 %v2120_v0  ;;  %873 = vmatmul.mubr.f32.gmra.mxu0 %v581_v52  ;;  %v459_v52 = vunpack.c.l.bf16 %v362_v44 }
 0x136   : > { %1037 = vmatprep.mubr.f32.mxu1 %v584_v53  ;;  %1104 = vmatpush2.msra.mxu0 %v602_v54  ;;  %v365_v53 = vld [vmem:[%s2341_s16 + $0xa0] sm:$0xff]  ;;  %v464_v54 = vunpack.c.h.bf16 %v364_v50 }
 0x137   : > { %1267 = vmatpush2.msra.mxu1 %v635_v56  ;;  %1105 = vmatprep.subr.mxu0 %v2120_v0  ;;  %v366_v56 = vld [vmem:[%s2341_s16 + $0xa8] sm:$0xff] }
 0x138   : > { %1038 = vmatmul.mubr.f32.gmra.mxu1 %v583_v57  ;;  %1268 = vmatprep.subr.mxu1 %v2120_v0  ;;  %v466_v57 = vunpack.c.h.bf16 %v365_v53  ;;  %v467_v1 = vunpack.c.l.bf16 %v366_v56 }
 0x139   : > { %1269 = vmatpush2.msra.mxu1 %v634_v60  ;;  %1106 = vmatpush2.msra.mxu0 %v601_v61  ;;  %v468_v60 = vunpack.c.h.bf16 %v366_v56  ;;  %v465_v61 = vunpack.c.l.bf16 %v365_v53 }
 0x13a   : > { %1107 = vmatprep.mubr.f32.mxu0 %v426_v62  ;;  %1270 = vmatprep.subr.mxu1 %v2120_v0  ;;  %v352_v0 = vld [vmem:[%s2341_s16 + $0x38] sm:$0xff] }
 0x13b   : > { %1108 = vmatmul.mubr.f32.vlgmr.msra.gmra.mxu0 %v425_v63  ;;  %1271 = vmatpush2.msra.mxu1 %v633_v2  ;;  %v440_v18 = vunpack.c.h.bf16 %v352_v0  ;;  %v439_v22 = vunpack.c.l.bf16 %v352_v0  ;;  %v368_v62 = vld [vmem:[%s2341_s16 + $0xb8] sm:$0xff]  ;;  %v470_v63 = vunpack.c.h.bf16 %v367_v59  ;;  %v369_v2 = vld [vmem:[%s2341_s16 + $0xc0] sm:$0xff] }
 0x13c   : > { %1272 = vmatprep.mubr.f32.mxu1 %v428_v3  ;;  %1112 = vmatprep.mubr.f32.mxu0 %v430_v4  ;;  %v472_v3 = vunpack.c.h.bf16 %v368_v62  ;;  %v469_v4 = vunpack.c.l.bf16 %v367_v59  ;;  %v474_v6 = vunpack.c.h.bf16 %v369_v2 }
 0x13d   : > { %1273 = vmatmul.mubr.f32.vlgmr.msra.gmra.mxu1 %v427_v5  ;;  %v370_v5 = vld [vmem:[%s2341_s16 + $0xc8] sm:$0xff] }
 0x13e   : > { %1277 = vmatprep.mubr.f32.mxu1 %v432_v7  ;;  %v471_v7 = vunpack.c.l.bf16 %v368_v62  ;;  %v476_v9 = vunpack.c.h.bf16 %v370_v5 }
 0x13f   : > { %1113 = vmatmul.mubr.f32.gmra.mxu0 %v429_v8  ;;  %v371_v8 = vld [vmem:[%s2341_s16 + $0xd0] sm:$0xff] }
 0x140   : > { %1117 = vmatprep.mubr.f32.mxu0 %v434_v10  ;;  %v473_v10 = vunpack.c.l.bf16 %v369_v2  ;;  %v478_v12 = vunpack.c.h.bf16 %v371_v8 }
 0x141   : > { %1278 = vmatmul.mubr.f32.gmra.mxu1 %v431_v11  ;;  %v372_v11 = vld [vmem:[%s2341_s16 + $0xd8] sm:$0xff] }
 0x142   : > { %1282 = vmatprep.mubr.f32.mxu1 %v436_v13  ;;  %v475_v13 = vunpack.c.l.bf16 %v370_v5  ;;  %v480_v0 = vunpack.c.h.bf16 %v372_v11 }
 0x143   : > { %1118 = vmatmul.mubr.f32.gmra.mxu0 %v433_v14  ;;  %v373_v14 = vld [vmem:[%s2341_s16 + $0xe0] sm:$0xff] }
 0x144   : > { %1122 = vmatprep.mubr.f32.mxu0 %v438_v15  ;;  %v477_v15 = vunpack.c.l.bf16 %v371_v8  ;;  %v482_v17 = vunpack.c.h.bf16 %v373_v14 }
 0x145   : > { %1283 = vmatmul.mubr.f32.gmra.mxu1 %v435_v16  ;;  %v374_v16 = vld [vmem:[%s2341_s16 + $0xe8] sm:$0xff] }
 0x146   : > { %1287 = vmatprep.mubr.f32.mxu1 %v440_v18  ;;  %v479_v18 = vunpack.c.l.bf16 %v372_v11  ;;  %v484_v20 = vunpack.c.h.bf16 %v374_v16 }
 0x147   : > { %1123 = vmatmul.mubr.f32.gmra.mxu0 %v437_v19  ;;  %v375_v19 = vld [vmem:[%s2341_s16 + $0xf0] sm:$0xff] }
 0x148   : > { %1127 = vmatprep.mubr.f32.mxu0 %v442_v21  ;;  %v481_v21 = vunpack.c.l.bf16 %v373_v14  ;;  %v486_v23 = vunpack.c.h.bf16 %v375_v19 }
 0x149   : > { %1288 = vmatmul.mubr.f32.gmra.mxu1 %v439_v22  ;;  %v376_v22 = vld [vmem:[%s2341_s16 + $0xf8] sm:$0xff] }
 0x14a   : > { %1292 = vmatprep.mubr.f32.mxu1 %v444_v24  ;;  %v483_v24 = vunpack.c.l.bf16 %v374_v16  ;;  %v488_v26 = vunpack.c.h.bf16 %v376_v22 }
 0x14b   : > { %1128 = vmatmul.mubr.f32.gmra.mxu0 %v441_v25  ;;  %v377_v25 = vld [vmem:[%s2341_s16 + $0x100] sm:$0xff] }
 0x14c   : > { %1132 = vmatprep.mubr.f32.mxu0 %v446_v27  ;;  %v485_v27 = vunpack.c.l.bf16 %v375_v19  ;;  %v490_v29 = vunpack.c.h.bf16 %v377_v25 }
 0x14d   : > { %1293 = vmatmul.mubr.f32.gmra.mxu1 %v443_v28  ;;  %v378_v28 = vld [vmem:[%s2341_s16 + $0x108] sm:$0xff] }
 0x14e   : > { %1297 = vmatprep.mubr.f32.mxu1 %v448_v30  ;;  %v487_v30 = vunpack.c.l.bf16 %v376_v22  ;;  %v492_v32 = vunpack.c.h.bf16 %v378_v28 }
 0x14f   : > { %1133 = vmatmul.mubr.f32.gmra.mxu0 %v445_v31  ;;  %v379_v31 = vld [vmem:[%s2341_s16 + $0x110] sm:$0xff] }
 0x150   : > { %1137 = vmatprep.mubr.f32.mxu0 %v450_v33  ;;  %v489_v33 = vunpack.c.l.bf16 %v377_v25  ;;  %v494_v35 = vunpack.c.h.bf16 %v379_v31 }
 0x151   : > { %1298 = vmatmul.mubr.f32.gmra.mxu1 %v447_v34  ;;  %v380_v34 = vld [vmem:[%s2341_s16 + $0x118] sm:$0xff] }
 0x152   : > { %1302 = vmatprep.mubr.f32.mxu1 %v452_v36  ;;  %v491_v36 = vunpack.c.l.bf16 %v378_v28  ;;  %v496_v38 = vunpack.c.h.bf16 %v380_v34 }
 0x153   : > { %1138 = vmatmul.mubr.f32.gmra.mxu0 %v449_v37  ;;  %v381_v37 = vld [vmem:[%s2341_s16 + $0x120] sm:$0xff] }
 0x154   : > { %1142 = vmatprep.mubr.f32.mxu0 %v454_v39  ;;  %v493_v39 = vunpack.c.l.bf16 %v379_v31  ;;  %v498_v41 = vunpack.c.h.bf16 %v381_v37 }
 0x155   : > { %1303 = vmatmul.mubr.f32.gmra.mxu1 %v451_v40  ;;  %v382_v40 = vld [vmem:[%s2341_s16 + $0x128] sm:$0xff] }
 0x156   : > { %1307 = vmatprep.mubr.f32.mxu1 %v456_v42  ;;  %v495_v42 = vunpack.c.l.bf16 %v380_v34  ;;  %v500_v44 = vunpack.c.h.bf16 %v382_v40 }
 0x157   : > { %1143 = vmatmul.mubr.f32.gmra.mxu0 %v453_v43  ;;  %v383_v43 = vld [vmem:[%s2341_s16 + $0x130] sm:$0xff] }
 0x158   : > { %1147 = vmatprep.mubr.f32.mxu0 %v458_v45  ;;  %v497_v45 = vunpack.c.l.bf16 %v381_v37  ;;  %v502_v47 = vunpack.c.h.bf16 %v383_v43  ;;  %v501_v50 = vunpack.c.l.bf16 %v383_v43 }
 0x159   : > { %1308 = vmatmul.mubr.f32.gmra.mxu1 %v455_v46  ;;  %v384_v46 = vld [vmem:[%s2341_s16 + $0x138] sm:$0xff] }
 0x15a   : > { %1312 = vmatprep.mubr.f32.mxu1 %v460_v48  ;;  %v499_v48 = vunpack.c.l.bf16 %v382_v40 }
 0x15b   : > { %1148 = vmatmul.mubr.f32.gmra.mxu0 %v457_v49  ;;  %v504_v49 = vunpack.c.h.bf16 %v384_v46 }
 0x15c   : > { %1152 = vmatprep.mubr.f32.mxu0 %v462_v51  ;;  %v503_v51 = vunpack.c.l.bf16 %v384_v46 }
 0x15d   : > { %1313 = vmatmul.mubr.f32.gmra.mxu1 %v459_v52 }
 0x15e   : > { %1317 = vmatprep.mubr.f32.mxu1 %v464_v54 }
 0x15f   : > { %1153 = vmatmul.mubr.f32.gmra.mxu0 %v461_v55 }
 0x160   : > { %1157 = vmatprep.mubr.f32.mxu0 %v466_v57 }
 0x161   : > { %1318 = vmatmul.mubr.f32.gmra.mxu1 %v463_v58 }
 0x162   : > { %1322 = vmatprep.mubr.f32.mxu1 %v468_v60 }
 0x163   : > { %1158 = vmatmul.mubr.f32.gmra.mxu0 %v465_v61 }
 0x164   : > { %1162 = vmatprep.mubr.f32.mxu0 %v470_v63 }
 0x165   : > { %1323 = vmatmul.mubr.f32.gmra.mxu1 %v467_v1 }
 0x166   : > { %1327 = vmatprep.mubr.f32.mxu1 %v472_v3 }
 0x167   : > { %1163 = vmatmul.mubr.f32.gmra.mxu0 %v469_v4 }
 0x168   : > { %1167 = vmatprep.mubr.f32.mxu0 %v474_v6 }
 0x169   : > { %1328 = vmatmul.mubr.f32.gmra.mxu1 %v471_v7 }
 0x16a   : > { %1332 = vmatprep.mubr.f32.mxu1 %v476_v9 }
 0x16b   : > { %1168 = vmatmul.mubr.f32.gmra.mxu0 %v473_v10 }
 0x16c   : > { %1172 = vmatprep.mubr.f32.mxu0 %v478_v12 }
 0x16d   : > { %1333 = vmatmul.mubr.f32.gmra.mxu1 %v475_v13 }
 0x16e   : > { %1337 = vmatprep.mubr.f32.mxu1 %v480_v0 }
 0x16f   : > { %1173 = vmatmul.mubr.f32.gmra.mxu0 %v477_v15 }
 0x170   : > { %1177 = vmatprep.mubr.f32.mxu0 %v482_v17 }
 0x171   : > { %1338 = vmatmul.mubr.f32.gmra.mxu1 %v479_v18 }
 0x172   : > { %1342 = vmatprep.mubr.f32.mxu1 %v484_v20 }
 0x173   : > { %1178 = vmatmul.mubr.f32.gmra.mxu0 %v481_v21 }
 0x174   : > { %1182 = vmatprep.mubr.f32.mxu0 %v486_v23 }
 0x175   : > { %1343 = vmatmul.mubr.f32.gmra.mxu1 %v483_v24 }
 0x176   : > { %1347 = vmatprep.mubr.f32.mxu1 %v488_v26 }
 0x177   : > { %1183 = vmatmul.mubr.f32.gmra.mxu0 %v485_v27 }
 0x178   : > { %1187 = vmatprep.mubr.f32.mxu0 %v490_v29 }
 0x179   : > { %1348 = vmatmul.mubr.f32.gmra.mxu1 %v487_v30 }
 0x17a   : > { %1352 = vmatprep.mubr.f32.mxu1 %v492_v32 }
 0x17b   : > { %1188 = vmatmul.mubr.f32.gmra.mxu0 %v489_v33 }
 0x17c   : > { %1192 = vmatprep.mubr.f32.mxu0 %v494_v35 }
 0x17d   : > { %1353 = vmatmul.mubr.f32.gmra.mxu1 %v491_v36 }
 0x17e   : > { %1357 = vmatprep.mubr.f32.mxu1 %v496_v38 }
 0x17f   : > { %1193 = vmatmul.mubr.f32.gmra.mxu0 %v493_v39 }
 0x180   : > { %1197 = vmatprep.mubr.f32.mxu0 %v498_v41 }
 0x181   : > { %1358 = vmatmul.mubr.f32.gmra.mxu1 %v495_v42 }
 0x182   : > { %1362 = vmatprep.mubr.f32.mxu1 %v500_v44 }
 0x183   : > { %1198 = vmatmul.mubr.f32.gmra.mxu0 %v497_v45 }
 0x184   : > { %1202 = vmatprep.mubr.f32.mxu0 %v502_v47 }
 0x185   : > { %1363 = vmatmul.mubr.f32.gmra.mxu1 %v499_v48 }
 0x186   : > { %1367 = vmatprep.mubr.f32.mxu1 %v504_v49 }
 0x187   : > { %1203 = vmatmul.mubr.f32.gmra.mxu0 %v501_v50 }
 0x189   : > { %1368 = vmatmul.mubr.f32.gmra.mxu1 %v503_v51 }
 0x193   : > { %v779_v52 = vpop.f32.mrf.mxu0 }
 0x195   : > { %v944_v53 = vpop.f32.mrf.mxu1  ;;  %v781_v54 = vpop.f32.mrf.mxu0 }
 0x196   : > { %v2570_v55 = vadd.f32 %v944_v53, %v779_v52 }
 0x197   : > { %v946_v56 = vpop.f32.mrf.mxu1 }
 0x198   : > { %v784_v57 = vpop.f32.mrf.mxu0 }
 0x199   : > { %v949_v58 = vpop.f32.mrf.mxu1 }
 0x19a   : > { %v2572_v59 = vadd.f32 %v949_v58, %v784_v57  ;;  %v786_v60 = vpop.f32.mrf.mxu0 }
 0x19b   : > { %v951_v61 = vpop.f32.mrf.mxu1 }
 0x19d   : > { %v789_v62 = vpop.f32.mrf.mxu0 }
 0x19f   : > { %v954_v63 = vpop.f32.mrf.mxu1  ;;  %v791_v1 = vpop.f32.mrf.mxu0 }
 0x1a0   : > { %v2574_v2 = vadd.f32 %v954_v63, %v789_v62 }
 0x1a1   : > { %v956_v3 = vpop.f32.mrf.mxu1 }
 0x1a2   : > { %v794_v4 = vpop.f32.mrf.mxu0 }
 0x1a4   : > { %v959_v5 = vpop.f32.mrf.mxu1  ;;  %v796_v6 = vpop.f32.mrf.mxu0 }
 0x1a5   : > { %v2576_v7 = vadd.f32 %v959_v5, %v794_v4 }
 0x1a6   : > { %v961_v8 = vpop.f32.mrf.mxu1 }
 0x1a7   : > { %v799_v9 = vpop.f32.mrf.mxu0 }
 0x1a9   : > { %v801_v10 = vpop.f32.mrf.mxu0 }
 0x1aa   : > { %v964_v11 = vpop.f32.mrf.mxu1 }
 0x1ab   : > { %v2578_v12 = vadd.f32 %v964_v11, %v799_v9 }
 0x1ac   : > { %v966_v13 = vpop.f32.mrf.mxu1 }
 0x1ad   : > { %v804_v14 = vpop.f32.mrf.mxu0 }
 0x1ae   : > { %v969_v0 = vpop.f32.mrf.mxu1 }
 0x1af   : > { %v2580_v15 = vadd.f32 %v969_v0, %v804_v14  ;;  %v806_v16 = vpop.f32.mrf.mxu0 }
 0x1b0   : > { %v971_v17 = vpop.f32.mrf.mxu1 }
 0x1b2   : > { %v809_v18 = vpop.f32.mrf.mxu0 }
 0x1b3   : > { %v974_v19 = vpop.f32.mrf.mxu1 }
 0x1b4   : > { %v2582_v20 = vadd.f32 %v974_v19, %v809_v18  ;;  %v811_v21 = vpop.f32.mrf.mxu0 }
 0x1b5   : > { %v976_v22 = vpop.f32.mrf.mxu1 }
 0x1b7   : > { %v814_v23 = vpop.f32.mrf.mxu0 }
 0x1b9   : > { %v979_v24 = vpop.f32.mrf.mxu1  ;;  %v816_v25 = vpop.f32.mrf.mxu0 }
 0x1ba   : > { %v2584_v26 = vadd.f32 %v979_v24, %v814_v23 }
 0x1bb   : > { %v981_v27 = vpop.f32.mrf.mxu1 }
 0x1bc   : > { %v819_v28 = vpop.f32.mrf.mxu0 }
 0x1be   : > { %v984_v29 = vpop.f32.mrf.mxu1  ;;  %v821_v30 = vpop.f32.mrf.mxu0 }
 0x1bf   : > { %v2586_v31 = vadd.f32 %v984_v29, %v819_v28 }
 0x1c0   : > { %v986_v32 = vpop.f32.mrf.mxu1 }
 0x1c1   : > { %v824_v33 = vpop.f32.mrf.mxu0 }
 0x1c3   : > { %v826_v34 = vpop.f32.mrf.mxu0 }
 0x1c4   : > { %v989_v35 = vpop.f32.mrf.mxu1 }
 0x1c5   : > { %v2588_v36 = vadd.f32 %v989_v35, %v824_v33 }
 0x1c6   : > { %v991_v37 = vpop.f32.mrf.mxu1 }
 0x1c7   : > { %v829_v38 = vpop.f32.mrf.mxu0 }
 0x1c8   : > { %v994_v39 = vpop.f32.mrf.mxu1 }
 0x1c9   : > { %v2590_v40 = vadd.f32 %v994_v39, %v829_v38  ;;  %v831_v41 = vpop.f32.mrf.mxu0  ;;  %v2614_v38 = vld [vmem:[%s2904_s4] ss:$0 sm:$0xff] }
 0x1ca   : > { %v996_v42 = vpop.f32.mrf.mxu1 }
 0x1cc   : > { %v834_v43 = vpop.f32.mrf.mxu0 }
 0x1cd   : > { %v999_v44 = vpop.f32.mrf.mxu1 }
 0x1ce   : > { %v2592_v45 = vadd.f32 %v999_v44, %v834_v43  ;;  %v836_v46 = vpop.f32.mrf.mxu0 }
 0x1cf   : > { %v1001_v47 = vpop.f32.mrf.mxu1 }
 0x1d1   : > { %v839_v48 = vpop.f32.mrf.mxu0 }
 0x1d3   : > { %v1004_v49 = vpop.f32.mrf.mxu1  ;;  %v841_v50 = vpop.f32.mrf.mxu0 }
 0x1d4   : > { %v2594_v51 = vadd.f32 %v1004_v49, %v839_v48 }
 0x1d5   : > { %v1006_v52 = vpop.f32.mrf.mxu1 }
 0x1d6   : > { %v844_v53 = vpop.f32.mrf.mxu0 }
 0x1d8   : > { %v1009_v54 = vpop.f32.mrf.mxu1  ;;  %v846_v56 = vpop.f32.mrf.mxu0 }
 0x1d9   : > { %v2596_v57 = vadd.f32 %v1009_v54, %v844_v53 }
 0x1da   : > { %v1011_v58 = vpop.f32.mrf.mxu1 }
 0x1db   : > { %v849_v60 = vpop.f32.mrf.mxu0 }
 0x1dd   : > { %v851_v61 = vpop.f32.mrf.mxu0 }
 0x1de   : > { %v1014_v62 = vpop.f32.mrf.mxu1 }
 0x1df   : > { %v2598_v63 = vadd.f32 %v1014_v62, %v849_v60 }
 0x1e0   : > { %v1016_v1 = vpop.f32.mrf.mxu1 }
 0x1e1   : > { %v854_v3 = vpop.f32.mrf.mxu0 }
 0x1e2   : > { %v1019_v4 = vpop.f32.mrf.mxu1 }
 0x1e3   : > { %v2600_v5 = vadd.f32 %v1019_v4, %v854_v3  ;;  %v856_v6 = vpop.f32.mrf.mxu0 }
 0x1e4   : > { %v1021_v8 = vpop.f32.mrf.mxu1 }
 0x1e6   : > { %v859_v9 = vpop.f32.mrf.mxu0 }
 0x1e7   : > { %v1024_v10 = vpop.f32.mrf.mxu1 }
 0x1e8   : > { %v2602_v11 = vadd.f32 %v1024_v10, %v859_v9  ;;  %v861_v13 = vpop.f32.mrf.mxu0 }
 0x1e9   : > { %v1026_v14 = vpop.f32.mrf.mxu1 }
 0x1eb   : > { %v864_v0 = vpop.f32.mrf.mxu0 }
 0x1ed   : > { %v1029_v16 = vpop.f32.mrf.mxu1  ;;  %v866_v17 = vpop.f32.mrf.mxu0 }
 0x1ee   : > { %v2604_v18 = vadd.f32 %v1029_v16, %v864_v0 }
 0x1ef   : > { %v1031_v19 = vpop.f32.mrf.mxu1 }
 0x1f0   : > { %v869_v21 = vpop.f32.mrf.mxu0 }
 0x1f2   : > { %v1034_v22 = vpop.f32.mrf.mxu1  ;;  %v871_v23 = vpop.f32.mrf.mxu0 }
 0x1f3   : > { %v2606_v24 = vadd.f32 %v1034_v22, %v869_v21 }
 0x1f4   : > { %v1036_v25 = vpop.f32.mrf.mxu1 }
 0x1f5   : > { %v874_v27 = vpop.f32.mrf.mxu0 }
 0x1f7   : > { %v876_v28 = vpop.f32.mrf.mxu0 }
 0x1f8   : > { %v1039_v29 = vpop.f32.mrf.mxu1 }
 0x1f9   : > { %v2608_v30 = vadd.f32 %v1039_v29, %v874_v27 }
 0x1fa   : > { %v1041_v32 = vpop.f32.mrf.mxu1 }
 0x1fb   : > { %v1109_v33 = vpop.f32.mrf.mxu0 }
 0x1fc   : > { %v1110_v34 = vadd.f32 %v1109_v33, %v2570_v55 }
 0x1fd   : > { %v1274_v35 = vpop.f32.mrf.mxu1  ;;  %v1111_v37 = vpop.f32.mrf.mxu0 }
 0x1fe   : > { %v1275_v39 = vadd.f32 %v1274_v35, %v1110_v34 }
 0x1ff   : > { %v1276_v41 = vpop.f32.mrf.mxu1  ;;  %v1114_v42 = vpop.f32.mrf.mxu0 }
 0x200   : > { %v1115_v43 = vadd.f32 %v1114_v42, %v2572_v59  ;;  %v2618_v44 = vadd.f32 %v2614_v38, %v1275_v39 }
 0x201   : > { %v1279_v46 = vpop.f32.mrf.mxu1  ;;  %v1116_v47 = vpop.f32.mrf.mxu0 }
 0x202   : > { %v1280_v48 = vadd.f32 %v1279_v46, %v1115_v43  ;;  %1400 = vmax.xlane.f32.xlu0 %v2618_v44 }
 0x203   : > { %v1281_v55 = vpop.f32.mrf.mxu1  ;;  %v1119_v49 = vpop.f32.mrf.mxu0 }
 0x204   : > { %v1120_v50 = vadd.f32 %v1119_v49, %v2574_v2  ;;  %v2623_v52 = vadd.f32 %v2614_v38, %v1280_v48 }
 0x205   : > { %v1284_v53 = vpop.f32.mrf.mxu1  ;;  %v1121_v54 = vpop.f32.mrf.mxu0 }
 0x206   : > { %v1285_v56 = vadd.f32 %v1284_v53, %v1120_v50  ;;  %1402 = vmax.xlane.f32.xlu0 %v2623_v52 }
 0x207   : > { %v1286_v59 = vpop.f32.mrf.mxu1  ;;  %v1124_v58 = vpop.f32.mrf.mxu0 }
 0x208   : > { %v1125_v60 = vadd.f32 %v1124_v58, %v2576_v7  ;;  %v2628_v61 = vadd.f32 %v2614_v38, %v1285_v56 }
 0x209   : > { %v1289_v62 = vpop.f32.mrf.mxu1  ;;  %v1126_v1 = vpop.f32.mrf.mxu0 }
 0x20a   : > { %v1290_v3 = vadd.f32 %v1289_v62, %v1125_v60  ;;  %1404 = vmax.xlane.f32.xlu1 %v2628_v61 }
 0x20b   : > { %v1291_v2 = vpop.f32.mrf.mxu1  ;;  %v1129_v4 = vpop.f32.mrf.mxu0 }
 0x20c   : > { %v1130_v6 = vadd.f32 %v1129_v4, %v2578_v12  ;;  %v2633_v8 = vadd.f32 %v2614_v38, %v1290_v3 }
 0x20d   : > { %v1294_v9 = vpop.f32.mrf.mxu1  ;;  %v1131_v10 = vpop.f32.mrf.mxu0 }
 0x20e   : > { %v1295_v13 = vadd.f32 %v1294_v9, %v1130_v6  ;;  %1406 = vmax.xlane.f32.xlu1 %v2633_v8 }
 0x20f   : > { %v1296_v7 = vpop.f32.mrf.mxu1  ;;  %v1134_v14 = vpop.f32.mrf.mxu0 }
 0x210   : > { %v1135_v0 = vadd.f32 %v1134_v14, %v2580_v15  ;;  %v2638_v16 = vadd.f32 %v2614_v38, %v1295_v13 }
 0x211   : > { %v1299_v17 = vpop.f32.mrf.mxu1  ;;  %v1136_v19 = vpop.f32.mrf.mxu0 }
 0x212   : > { %v1300_v21 = vadd.f32 %v1299_v17, %v1135_v0  ;;  %1408 = vmax.xlane.f32.xlu0 %v2638_v16 }
 0x213   : > { %v1301_v12 = vpop.f32.mrf.mxu1  ;;  %v1139_v22 = vpop.f32.mrf.mxu0 }
 0x214   : > { %v1140_v23 = vadd.f32 %v1139_v22, %v2582_v20  ;;  %v2643_v25 = vadd.f32 %v2614_v38, %v1300_v21 }
 0x215   : > { %v1304_v27 = vpop.f32.mrf.mxu1  ;;  %v1141_v28 = vpop.f32.mrf.mxu0 }
 0x216   : > { %v1305_v29 = vadd.f32 %v1304_v27, %v1140_v23  ;;  %1410 = vmax.xlane.f32.xlu1 %v2643_v25 }
 0x217   : > { %v1306_v15 = vpop.f32.mrf.mxu1  ;;  %v1144_v32 = vpop.f32.mrf.mxu0 }
 0x218   : > { %v1145_v33 = vadd.f32 %v1144_v32, %v2584_v26  ;;  %v2648_v34 = vadd.f32 %v2614_v38, %v1305_v29 }
 0x219   : > { %v1309_v35 = vpop.f32.mrf.mxu1  ;;  %v1146_v37 = vpop.f32.mrf.mxu0 }
 0x21a   : > { %v1310_v39 = vadd.f32 %v1309_v35, %v1145_v33  ;;  %1412 = vmax.xlane.f32.xlu0 %v2648_v34 }
 0x21b   : > { %v1311_v20 = vpop.f32.mrf.mxu1  ;;  %v1149_v41 = vpop.f32.mrf.mxu0 }
 0x21c   : > { %v1150_v42 = vadd.f32 %v1149_v41, %v2586_v31  ;;  %v2653_v43 = vadd.f32 %v2614_v38, %v1310_v39 }
 0x21d   : > { %v1314_v46 = vpop.f32.mrf.mxu1  ;;  %v1151_v47 = vpop.f32.mrf.mxu0 }
 0x21e   : > { %v1315_v48 = vadd.f32 %v1314_v46, %v1150_v42  ;;  %1414 = vmax.xlane.f32.xlu1 %v2653_v43 }
 0x21f   : > { %v1316_v26 = vpop.f32.mrf.mxu1  ;;  %v1154_v55 = vpop.f32.mrf.mxu0 }
 0x220   : > { %v1155_v49 = vadd.f32 %v1154_v55, %v2588_v36  ;;  %v2658_v50 = vadd.f32 %v2614_v38, %v1315_v48 }
 0x221   : > { %v1319_v53 = vpop.f32.mrf.mxu1  ;;  %v1156_v54 = vpop.f32.mrf.mxu0 }
 0x222   : > { %v1320_v56 = vadd.f32 %v1319_v53, %v1155_v49  ;;  %1416 = vmax.xlane.f32.xlu0 %v2658_v50 }
 0x223   : > { %v1321_v31 = vpop.f32.mrf.mxu1  ;;  %v1159_v59 = vpop.f32.mrf.mxu0 }
 0x224   : > { %v1160_v58 = vadd.f32 %v1159_v59, %v2590_v40  ;;  %v2663_v60 = vadd.f32 %v2614_v38, %v1320_v56 }
 0x225   : > { %v1324_v62 = vpop.f32.mrf.mxu1  ;;  %v1161_v1 = vpop.f32.mrf.mxu0 }
 0x226   : > { %v1325_v3 = vadd.f32 %v1324_v62, %v1160_v58  ;;  %1418 = vmax.xlane.f32.xlu1 %v2663_v60 }
 0x227   : > { %v1326_v36 = vpop.f32.mrf.mxu1  ;;  %v1164_v2 = vpop.f32.mrf.mxu0 }
 0x228   : > { %v1165_v4 = vadd.f32 %v1164_v2, %v2592_v45  ;;  %v2668_v6 = vadd.f32 %v2614_v38, %v1325_v3 }
 0x229   : > { %v1329_v9 = vpop.f32.mrf.mxu1  ;;  %v1166_v10 = vpop.f32.mrf.mxu0 }
 0x22a   : > { %v1330_v13 = vadd.f32 %v1329_v9, %v1165_v4  ;;  %1420 = vmax.xlane.f32.xlu0 %v2668_v6 }
 0x22b   : > { %v1331_v40 = vpop.f32.mrf.mxu1  ;;  %v1169_v7 = vpop.f32.mrf.mxu0 }
 0x22c   : > { %v1170_v14 = vadd.f32 %v1169_v7, %v2594_v51  ;;  %v2673_v0 = vadd.f32 %v2614_v38, %v1330_v13 }
 0x22d   : > { %v1334_v17 = vpop.f32.mrf.mxu1  ;;  %v1171_v19 = vpop.f32.mrf.mxu0 }
 0x22e   : > { %v1335_v21 = vadd.f32 %v1334_v17, %v1170_v14  ;;  %1422 = vmax.xlane.f32.xlu1 %v2673_v0 }
 0x22f   : > { %v1336_v45 = vpop.f32.mrf.mxu1  ;;  %v1174_v12 = vpop.f32.mrf.mxu0 }
 0x230   : > { %v1175_v22 = vadd.f32 %v1174_v12, %v2596_v57  ;;  %v2678_v23 = vadd.f32 %v2614_v38, %v1335_v21 }
 0x231   : > { %v1339_v27 = vpop.f32.mrf.mxu1  ;;  %v1176_v28 = vpop.f32.mrf.mxu0 }
 0x232   : > { %v1340_v29 = vadd.f32 %v1339_v27, %v1175_v22  ;;  %1424 = vmax.xlane.f32.xlu0 %v2678_v23 }
 0x233   : > { %v1341_v51 = vpop.f32.mrf.mxu1  ;;  %v1179_v15 = vpop.f32.mrf.mxu0 }
 0x234   : > { %v1180_v32 = vadd.f32 %v1179_v15, %v2598_v63  ;;  %v2683_v33 = vadd.f32 %v2614_v38, %v1340_v29 }
 0x235   : > { %v1344_v35 = vpop.f32.mrf.mxu1  ;;  %v1181_v37 = vpop.f32.mrf.mxu0 }
 0x236   : > { %v1345_v39 = vadd.f32 %v1344_v35, %v1180_v32  ;;  %1426 = vmax.xlane.f32.xlu1 %v2683_v33 }
 0x237   : > { %v1346_v57 = vpop.f32.mrf.mxu1  ;;  %v1184_v20 = vpop.f32.mrf.mxu0 }
 0x238   : > { %v1185_v41 = vadd.f32 %v1184_v20, %v2600_v5  ;;  %v2688_v42 = vadd.f32 %v2614_v38, %v1345_v39 }
 0x239   : > { %v1349_v46 = vpop.f32.mrf.mxu1  ;;  %v1186_v47 = vpop.f32.mrf.mxu0 }
 0x23a   : > { %v1350_v48 = vadd.f32 %v1349_v46, %v1185_v41  ;;  %1428 = vmax.xlane.f32.xlu0 %v2688_v42 }
 0x23b   : > { %v1351_v63 = vpop.f32.mrf.mxu1  ;;  %v1189_v26 = vpop.f32.mrf.mxu0 }
 0x23c   : > { %v1190_v55 = vadd.f32 %v1189_v26, %v2602_v11  ;;  %v2693_v49 = vadd.f32 %v2614_v38, %v1350_v48 }
 0x23d   : > { %v1354_v53 = vpop.f32.mrf.mxu1  ;;  %v1191_v54 = vpop.f32.mrf.mxu0 }
 0x23e   : > { %v1355_v56 = vadd.f32 %v1354_v53, %v1190_v55  ;;  %1430 = vmax.xlane.f32.xlu1 %v2693_v49 }
 0x23f   : > { %v1356_v5 = vpop.f32.mrf.mxu1  ;;  %v1194_v31 = vpop.f32.mrf.mxu0 }
 0x240   : > { %v1195_v59 = vadd.f32 %v1194_v31, %v2604_v18  ;;  %v2698_v58 = vadd.f32 %v2614_v38, %v1355_v56 }
 0x241   : > { %v1359_v62 = vpop.f32.mrf.mxu1  ;;  %v1196_v1 = vpop.f32.mrf.mxu0 }
 0x242   : > { %v1360_v3 = vadd.f32 %v1359_v62, %v1195_v59  ;;  %1432 = vmax.xlane.f32.xlu0 %v2698_v58 }
 0x243   : > { %v1361_v11 = vpop.f32.mrf.mxu1  ;;  %v1199_v36 = vpop.f32.mrf.mxu0 }
 0x244   : > { %v1200_v2 = vadd.f32 %v1199_v36, %v2606_v24  ;;  %v2703_v4 = vadd.f32 %v2614_v38, %v1360_v3 }
 0x245   : > { %v1364_v9 = vpop.f32.mrf.mxu1  ;;  %v1201_v10 = vpop.f32.mrf.mxu0 }
 0x246   : > { %v1365_v13 = vadd.f32 %v1364_v9, %v1200_v2  ;;  %1434 = vmax.xlane.f32.xlu1 %v2703_v4 }
 0x247   : > { %v1366_v18 = vpop.f32.mrf.mxu1  ;;  %v1204_v40 = vpop.f32.mrf.mxu0 }
 0x248   : > { %v1205_v7 = vadd.f32 %v1204_v40, %v2608_v30  ;;  %v2708_v14 = vadd.f32 %v2614_v38, %v1365_v13 }
 0x249   : > { %v1369_v17 = vpop.f32.mrf.mxu1  ;;  %v1206_v19 = vpop.f32.mrf.mxu0 }
 0x24a   : > { %v1370_v21 = vadd.f32 %v1369_v17, %v1205_v7  ;;  %1436 = vmax.xlane.f32.xlu0 %v2708_v14 }
 0x24b   : > { %v1371_v24 = vpop.f32.mrf.mxu1 }
 0x24c   : > { %v2712_v45 = vadd.f32 %v2614_v38, %v1370_v21 }
 0x24e   : > { %1438 = vmax.xlane.f32.xlu1 %v2712_v45 }
 0x28b   : > { %v1401_v12 = vpop.xlane.xlu0 %1400 }
 0x28c   : > { %v1440_v22 = vsub.f32 %v2618_v44, %v1401_v12 }
 0x28e   : > { %v1460_v27 = vmul.f32 1.442695, %v1440_v22 }
 0x28f   : > { %v1403_v28 = vpop.xlane.xlu0 %1402 }
 0x290   : > { %1848 = vpow2.f32 %v1460_v27  ;;  %v1441_v30 = vsub.f32 %v2623_v52, %v1403_v28 }
 0x292   : > { %v1462_v29 = vmul.f32 1.442695, %v1441_v30 }
 0x293   : > { %v1405_v51 = vpop.xlane.xlu1 %1404 }
 0x294   : > { %1850 = vpow2.f32 %v1462_v29  ;;  %v1442_v15 = vsub.f32 %v2628_v61, %v1405_v51 }
 0x296   : > { %v1464_v32 = vmul.f32 1.442695, %v1442_v15 }
 0x297   : > { %v1407_v35 = vpop.xlane.xlu1 %1406 }
 0x298   : > { %1852 = vpow2.f32 %v1464_v32  ;;  %v1443_v38 = vsub.f32 %v2633_v8, %v1407_v35 }
 0x29a   : > { %v1466_v37 = vmul.f32 1.442695, %v1443_v38 }
 0x29b   : > { %v1409_v39 = vpop.xlane.xlu0 %1408 }
 0x29c   : > { %1854 = vpow2.f32 %v1466_v37  ;;  %v1444_v44 = vsub.f32 %v2638_v16, %v1409_v39 }
 0x29d   : > { %v2720_v57 = vpop.eup %1848 }
 0x29e   : > { %v1468_v20 = vmul.f32 1.442695, %v1444_v44  ;;  %1500 = vadd.xlane.f32.xlu0 %v2720_v57 }
 0x29f   : > { %v1411_v52 = vpop.xlane.xlu1 %1410 }
 0x2a0   : > { %1856 = vpow2.f32 %v1468_v20  ;;  %v1445_v41 = vsub.f32 %v2643_v25, %v1411_v52 }
 0x2a1   : > { %v2724_v61 = vpop.eup %1850 }
 0x2a2   : > { %v1470_v46 = vmul.f32 1.442695, %v1445_v41  ;;  %1502 = vadd.xlane.f32.xlu1 %v2724_v61 }
 0x2a3   : > { %v1413_v8 = vpop.xlane.xlu0 %1412 }
 0x2a4   : > { %1858 = vpow2.f32 %v1470_v46  ;;  %v1446_v47 = vsub.f32 %v2648_v34, %v1413_v8 }
 0x2a5   : > { %v2728_v48 = vpop.eup %1852 }
 0x2a6   : > { %v1472_v16 = vmul.f32 1.442695, %v1446_v47  ;;  %1504 = vadd.xlane.f32.xlu0 %v2728_v48 }
 0x2a7   : > { %v1415_v63 = vpop.xlane.xlu1 %1414 }
 0x2a8   : > { %1860 = vpow2.f32 %v1472_v16  ;;  %v1447_v26 = vsub.f32 %v2653_v43, %v1415_v63 }
 0x2a9   : > { %v2732_v55 = vpop.eup %1854 }
 0x2aa   : > { %v1474_v25 = vmul.f32 1.442695, %v1447_v26  ;;  %1506 = vadd.xlane.f32.xlu1 %v2732_v55 }
 0x2ab   : > { %v1417_v53 = vpop.xlane.xlu0 %1416 }
 0x2ac   : > { %1862 = vpow2.f32 %v1474_v25  ;;  %v1448_v54 = vsub.f32 %v2658_v50, %v1417_v53 }
 0x2ad   : > { %v2736_v56 = vpop.eup %1856 }
 0x2ae   : > { %v1476_v34 = vmul.f32 1.442695, %v1448_v54  ;;  %1508 = vadd.xlane.f32.xlu0 %v2736_v56 }
 0x2af   : > { %v1419_v5 = vpop.xlane.xlu1 %1418 }
 0x2b0   : > { %1864 = vpow2.f32 %v1476_v34  ;;  %v1449_v31 = vsub.f32 %v2663_v60, %v1419_v5 }
 0x2b1   : > { %v2740_v59 = vpop.eup %1858 }
 0x2b2   : > { %v1478_v43 = vmul.f32 1.442695, %v1449_v31  ;;  %1510 = vadd.xlane.f32.xlu1 %v2740_v59 }
 0x2b3   : > { %v1421_v62 = vpop.xlane.xlu0 %1420 }
 0x2b4   : > { %1866 = vpow2.f32 %v1478_v43  ;;  %v1450_v1 = vsub.f32 %v2668_v6, %v1421_v62 }
 0x2b5   : > { %v2744_v3 = vpop.eup %1860 }
 0x2b6   : > { %v1480_v50 = vmul.f32 1.442695, %v1450_v1  ;;  %1512 = vadd.xlane.f32.xlu0 %v2744_v3 }
 0x2b7   : > { %v1423_v11 = vpop.xlane.xlu1 %1422 }
 0x2b8   : > { %1868 = vpow2.f32 %v1480_v50  ;;  %v1451_v36 = vsub.f32 %v2673_v0, %v1423_v11 }
 0x2b9   : > { %v2748_v2 = vpop.eup %1862 }
 0x2ba   : > { %v1482_v60 = vmul.f32 1.442695, %v1451_v36  ;;  %1514 = vadd.xlane.f32.xlu1 %v2748_v2 }
 0x2bb   : > { %v1425_v9 = vpop.xlane.xlu0 %1424 }
 0x2bc   : > { %1870 = vpow2.f32 %v1482_v60  ;;  %v1452_v10 = vsub.f32 %v2678_v23, %v1425_v9 }
 0x2bd   : > { %v2752_v13 = vpop.eup %1864 }
 0x2be   : > { %v1484_v6 = vmul.f32 1.442695, %v1452_v10  ;;  %1516 = vadd.xlane.f32.xlu0 %v2752_v13 }
 0x2bf   : > { %v1427_v18 = vpop.xlane.xlu1 %1426 }
 0x2c0   : > { %1872 = vpow2.f32 %v1484_v6  ;;  %v1453_v40 = vsub.f32 %v2683_v33, %v1427_v18 }
 0x2c1   : > { %v2756_v7 = vpop.eup %1866 }
 0x2c2   : > { %v1486_v0 = vmul.f32 1.442695, %v1453_v40  ;;  %1518 = vadd.xlane.f32.xlu1 %v2756_v7 }
 0x2c3   : > { %v1429_v17 = vpop.xlane.xlu0 %1428 }
 0x2c4   : > { %1874 = vpow2.f32 %v1486_v0  ;;  %v1454_v19 = vsub.f32 %v2688_v42, %v1429_v17 }
 0x2c5   : > { %v2760_v21 = vpop.eup %1868 }
 0x2c6   : > { %v1488_v23 = vmul.f32 1.442695, %v1454_v19  ;;  %1520 = vadd.xlane.f32.xlu0 %v2760_v21 }
 0x2c7   : > { %v1431_v24 = vpop.xlane.xlu1 %1430 }
 0x2c8   : > { %1876 = vpow2.f32 %v1488_v23  ;;  %v1455_v12 = vsub.f32 %v2693_v49, %v1431_v24 }
 0x2c9   : > { %v2764_v22 = vpop.eup %1870 }
 0x2ca   : > { %v1490_v33 = vmul.f32 1.442695, %v1455_v12  ;;  %1522 = vadd.xlane.f32.xlu1 %v2764_v22 }
 0x2cb   : > { %v1433_v27 = vpop.xlane.xlu0 %1432 }
 0x2cc   : > { %1878 = vpow2.f32 %v1490_v33  ;;  %v1456_v28 = vsub.f32 %v2698_v58, %v1433_v27 }
 0x2cd   : > { %v2768_v30 = vpop.eup %1872 }
 0x2ce   : > { %v1492_v42 = vmul.f32 1.442695, %v1456_v28  ;;  %1524 = vadd.xlane.f32.xlu0 %v2768_v30 }
 0x2cf   : > { %v1435_v29 = vpop.xlane.xlu1 %1434 }
 0x2d0   : > { %1880 = vpow2.f32 %v1492_v42  ;;  %v1457_v51 = vsub.f32 %v2703_v4, %v1435_v29 }
 0x2d1   : > { %v2772_v15 = vpop.eup %1874 }
 0x2d2   : > { %v1494_v49 = vmul.f32 1.442695, %v1457_v51  ;;  %1526 = vadd.xlane.f32.xlu1 %v2772_v15 }
 0x2d3   : > { %v1437_v32 = vpop.xlane.xlu0 %1436 }
 0x2d4   : > { %1882 = vpow2.f32 %v1494_v49  ;;  %v1458_v35 = vsub.f32 %v2708_v14, %v1437_v32 }
 0x2d5   : > { %v2776_v38 = vpop.eup %1876 }
 0x2d6   : > { %v1496_v58 = vmul.f32 1.442695, %v1458_v35  ;;  %1528 = vadd.xlane.f32.xlu0 %v2776_v38 }
 0x2d7   : > { %v1439_v37 = vpop.xlane.xlu1 %1438 }
 0x2d8   : > { %1884 = vpow2.f32 %v1496_v58  ;;  %v1459_v39 = vsub.f32 %v2712_v45, %v1439_v37 }
 0x2d9   : > { %v2780_v44 = vpop.eup %1878 }
 0x2da   : > { %v1498_v4 = vmul.f32 1.442695, %v1459_v39  ;;  %1530 = vadd.xlane.f32.xlu1 %v2780_v44 }
 0x2dc   : > { %1886 = vpow2.f32 %v1498_v4 }
 0x2dd   : > { %v2783_v20 = vpop.eup %1880 }
 0x2de   : > { %1532 = vadd.xlane.f32.xlu0 %v2783_v20 }
 0x2e1   : > { %v2786_v14 = vpop.eup %1882 }
 0x2e2   : > { %1534 = vadd.xlane.f32.xlu1 %v2786_v14 }
 0x2e5   : > { %v2789_v52 = vpop.eup %1884 }
 0x2e6   : > { %1536 = vadd.xlane.f32.xlu0 %v2789_v52 }
 0x2e9   : > { %v2792_v45 = vpop.eup %1886 }
 0x2ea   : > { %1538 = vadd.xlane.f32.xlu1 %v2792_v45 }
 0x327   : > { %v1501_v41 = vpop.xlane.xlu0 %1500 }
 0x328   : > { %1888 = vrcp.f32 %v1501_v41 }
 0x32b   : > { %v1503_v46 = vpop.xlane.xlu1 %1502 }
 0x32c   : > { %1890 = vrcp.f32 %v1503_v46 }
 0x32f   : > { %v1505_v8 = vpop.xlane.xlu0 %1504 }
 0x330   : > { %1892 = vrcp.f32 %v1505_v8 }
 0x333   : > { %v1507_v47 = vpop.xlane.xlu1 %1506 }
 0x334   : > { %1894 = vrcp.f32 %v1507_v47 }
 0x335   : > { %v1889_v16 = vpop.eup %1888 }
 0x336   : > { %v1541_v63 = vmul.f32 %v1889_v16, %v2720_v57 }
 0x337   : > { %v1509_v26 = vpop.xlane.xlu0 %1508 }
 0x338   : > { %1580 = vst [vmem:[%s2797_s23] sm:$0xff] %v1541_v63  ;;  %1896 = vrcp.f32 %v1509_v26 }
 0x339   : > { %v1891_v25 = vpop.eup %1890 }
 0x33a   : > { %v1543_v53 = vmul.f32 %v1891_v25, %v2724_v61 }
 0x33b   : > { %v1511_v54 = vpop.xlane.xlu1 %1510 }
 0x33c   : > { %1581 = vst [vmem:[%s2797_s23 + $0x8] sm:$0xff] %v1543_v53  ;;  %1898 = vrcp.f32 %v1511_v54 }
 0x33d   : > { %v1893_v34 = vpop.eup %1892 }
 0x33e   : > { %v1545_v5 = vmul.f32 %v1893_v34, %v2728_v48 }
 0x33f   : > { %v1513_v57 = vpop.xlane.xlu0 %1512 }
 0x340   : > { %1582 = vst [vmem:[%s2797_s23 + $0x10] sm:$0xff] %v1545_v5  ;;  %1900 = vrcp.f32 %v1513_v57 }
 0x341   : > { %v1895_v31 = vpop.eup %1894 }
 0x342   : > { %v1547_v43 = vmul.f32 %v1895_v31, %v2732_v55 }
 0x343   : > { %v1515_v62 = vpop.xlane.xlu1 %1514 }
 0x344   : > { %1583 = vst [vmem:[%s2797_s23 + $0x18] sm:$0xff] %v1547_v43  ;;  %1902 = vrcp.f32 %v1515_v62 }
 0x345   : > { %v1897_v1 = vpop.eup %1896 }
 0x346   : > { %v1549_v61 = vmul.f32 %v1897_v1, %v2736_v56 }
 0x347   : > { %v1517_v50 = vpop.xlane.xlu0 %1516 }
 0x348   : > { %1584 = vst [vmem:[%s2797_s23 + $0x20] sm:$0xff] %v1549_v61  ;;  %1904 = vrcp.f32 %v1517_v50 }
 0x349   : > { %v1899_v11 = vpop.eup %1898 }
 0x34a   : > { %v1551_v48 = vmul.f32 %v1899_v11, %v2740_v59 }
 0x34b   : > { %v1519_v36 = vpop.xlane.xlu1 %1518 }
 0x34c   : > { %1585 = vst [vmem:[%s2797_s23 + $0x28] sm:$0xff] %v1551_v48  ;;  %1906 = vrcp.f32 %v1519_v36 }
 0x34d   : > { %v1901_v60 = vpop.eup %1900 }
 0x34e   : > { %v1553_v55 = vmul.f32 %v1901_v60, %v2744_v3 }
 0x34f   : > { %v1521_v9 = vpop.xlane.xlu0 %1520 }
 0x350   : > { %1586 = vst [vmem:[%s2797_s23 + $0x30] sm:$0xff] %v1553_v55  ;;  %1908 = vrcp.f32 %v1521_v9 }
 0x351   : > { %v1903_v10 = vpop.eup %1902 }
 0x352   : > { %v1555_v56 = vmul.f32 %v1903_v10, %v2748_v2 }
 0x353   : > { %v1523_v6 = vpop.xlane.xlu1 %1522 }
 0x354   : > { %1587 = vst [vmem:[%s2797_s23 + $0x38] sm:$0xff] %v1555_v56  ;;  %1910 = vrcp.f32 %v1523_v6 }
 0x355   : > { %v1905_v18 = vpop.eup %1904 }
 0x356   : > { %v1557_v59 = vmul.f32 %v1905_v18, %v2752_v13 }
 0x357   : > { %v1525_v40 = vpop.xlane.xlu0 %1524 }
 0x358   : > { %1588 = vst [vmem:[%s2797_s23 + $0x40] sm:$0xff] %v1557_v59  ;;  %1912 = vrcp.f32 %v1525_v40 }
 0x359   : > { %v1907_v0 = vpop.eup %1906 }
 0x35a   : > { %v1559_v3 = vmul.f32 %v1907_v0, %v2756_v7 }
 0x35b   : > { %v1527_v17 = vpop.xlane.xlu1 %1526 }
 0x35c   : > { %1589 = vst [vmem:[%s2797_s23 + $0x48] sm:$0xff] %v1559_v3  ;;  %1914 = vrcp.f32 %v1527_v17 }
 0x35d   : > { %v1909_v19 = vpop.eup %1908 }
 0x35e   : > { %v1561_v2 = vmul.f32 %v1909_v19, %v2760_v21 }
 0x35f   : > { %v1529_v23 = vpop.xlane.xlu0 %1528 }
 0x360   : > { %1590 = vst [vmem:[%s2797_s23 + $0x50] sm:$0xff] %v1561_v2  ;;  %1916 = vrcp.f32 %v1529_v23 }
 0x361   : > { %v1911_v24 = vpop.eup %1910 }
 0x362   : > { %v1563_v13 = vmul.f32 %v1911_v24, %v2764_v22 }
 0x363   : > { %v1531_v12 = vpop.xlane.xlu1 %1530 }
 0x364   : > { %1591 = vst [vmem:[%s2797_s23 + $0x58] sm:$0xff] %v1563_v13  ;;  %1918 = vrcp.f32 %v1531_v12 }
 0x365   : > { %v1913_v33 = vpop.eup %1912 }
 0x366   : > { %v1565_v7 = vmul.f32 %v1913_v33, %v2768_v30 }
 0x367   : > { %v1533_v27 = vpop.xlane.xlu0 %1532 }
 0x368   : > { %1592 = vst [vmem:[%s2797_s23 + $0x60] sm:$0xff] %v1565_v7  ;;  %1920 = vrcp.f32 %v1533_v27 }
 0x369   : > { %v1915_v28 = vpop.eup %1914 }
 0x36a   : > { %v1567_v21 = vmul.f32 %v1915_v28, %v2772_v15 }
 0x36b   : > { %v1535_v42 = vpop.xlane.xlu1 %1534 }
 0x36c   : > { %1593 = vst [vmem:[%s2797_s23 + $0x68] sm:$0xff] %v1567_v21  ;;  %1922 = vrcp.f32 %v1535_v42 }
 0x36d   : > { %v1917_v22 = vpop.eup %1916 }
 0x36e   : > { %v1569_v29 = vmul.f32 %v1917_v22, %v2776_v38 }
 0x36f   : > { %v1537_v51 = vpop.xlane.xlu0 %1536 }
 0x370   : > { %1594 = vst [vmem:[%s2797_s23 + $0x70] sm:$0xff] %v1569_v29  ;;  %1924 = vrcp.f32 %v1537_v51 }
 0x371   : > { %v1919_v30 = vpop.eup %1918 }
 0x372   : > { %v1571_v49 = vmul.f32 %v1919_v30, %v2780_v44 }
 0x373   : > { %v1539_v32 = vpop.xlane.xlu1 %1538 }
 0x374   : > { %1595 = vst [vmem:[%s2797_s23 + $0x78] sm:$0xff] %v1571_v49  ;;  %1926 = vrcp.f32 %v1539_v32 }
 0x375   : > { %v1921_v15 = vpop.eup %1920 }
 0x376   : > { %v1573_v35 = vmul.f32 %v1921_v15, %v2783_v20 }
 0x378   : > { %1596 = vst [vmem:[%s2797_s23 + $0x80] sm:$0xff] %v1573_v35 }
 0x379   : > { %v1923_v58 = vpop.eup %1922 }
 0x37a   : > { %v1575_v37 = vmul.f32 %v1923_v58, %v2786_v14 }
 0x37c   : > { %1597 = vst [vmem:[%s2797_s23 + $0x88] sm:$0xff] %v1575_v37 }
 0x37d   : > { %v1925_v38 = vpop.eup %1924 }
 0x37e   : > { %v1577_v39 = vmul.f32 %v1925_v38, %v2789_v52 }
 0x380   : > { %1598 = vst [vmem:[%s2797_s23 + $0x90] sm:$0xff] %v1577_v39  ;;  %1607 = sbr.rel (!%p2922_p9) target bundleno = 928 (0x3a0), region = 60 }
 0x381   : > { %v1927_v4 = vpop.eup %1926 }
 0x382   : > { %v1579_v41 = vmul.f32 %v1927_v4, %v2792_v45 }
 0x384   : > { %1599 = vst [vmem:[%s2797_s23 + $0x98] sm:$0xff] %v1579_v41 }
 0x385   : > { %s2934_s28 = smov (!%p1610_p12, %s1609_s28), 20 }
 0x386   : > { %s2842_s17 = sshll.u32 %s2934_s28, 7 }
 0x387   : > { %s1614_s26 = ssub.s32 2560, %s2842_s17 }
 0x388   : > { %1615 = vsyncadd %s1601_s9, %s1614_s26  ;;  %p1759_p4 = scmp.ne.s32.totalorder %s2842_s17, 0  ;;  %s1771_s30 = smul.u32 2560, %s2175_s22 }
 0x389   : > { %s1620_s11 = sshll.u32 %s2797_s23, 4  ;;  %s2121_s7 = smov [#allocation10]   ;;  %s2855_s11 = int_to_ptr.vmem [resolvable:$true] %s1620_s11 }
 0x38a   : > { %s2853_s16 = scalar_lea.hbm %s2905_s5, %s1771_s30  ;;  %s2032_s0 = scalar_lea.vmem %s2855_s11, %s2842_s17 }
 0x38b   : > { %p2033_p11 = scmp.ne.s32.totalorder %s2855_s11, %s2032_s0  ;;  %s2036_s25 = sshll.u32 %s2121_s7, 4  ;;  %s2037_s25 = int_to_ptr.vmem [resolvable:$false] %s2036_s25 }
 0x38c   : > { %s2038_s22 = scalar_lea.vmem %s2037_s25, 5120  ;;  %p2039_p8 = scmp.lt.s32.totalorder %s2855_s11, %s2037_s25 }
 0x38d   : > { %p2034_p2 = pnand %p2033_p11, %p1759_p4  ;;  %p2040_p6 = scmp.lt.s32.totalorder %s2038_s22, %s2032_s0 }
 0x38f   : > { %p2035_p10 = pneg %p2034_p2  ;;  %p2041_p0 = por %p2040_p6, %p2039_p8 }
 0x391   : > { %p2042_p1 = pnand %p2041_p0, %p2035_p10 }
 0x393   : > { %2045 = shalt.err (!%p2042_p1)
}
 0x394   : > { %s2046_s29 = scalar_lea.hbm %s2853_s16, %s2842_s17  ;;  %s2050_s23 = scalar_lea.hbm %s2905_s5, 4864 }
 0x395   : > { %p2047_p13 = scmp.ne.s32.totalorder %s2853_s16, %s2046_s29  ;;  %p2051_p7 = scmp.lt.s32.totalorder %s2853_s16, %s2905_s5 }
 0x396   : > { %p2052_p9 = scmp.lt.s32.totalorder %s2050_s23, %s2046_s29 }
 0x397   : > { %p2048_p5 = pnand %p2047_p13, %p1759_p4 }
 0x398   : > { %p2053_p12 = por %p2052_p9, %p2051_p7 }
 0x399   : > { %p2049_p3 = pneg %p2048_p5 }
 0x39b   : > { %p2054_p11 = pnand %p2053_p12, %p2049_p3 }
 0x39d   : > { %2057 = shalt.err (!%p2054_p11)
}
 0x39e   : > { %s2122_s26 = smov 128   ;;  %s2123_s30 = smov 8  }
 0x39f   : > { %1626 = dma.vmem_to_hbm [thread:$0]  (%p1759_p4), %s2855_s11, %s2842_s17, %s2853_s16, %s1601_s9, %s2122_s26, %s2122_s26, %s2123_s30  }
 0x3a0 PF: > { %s1635_s12 = sand.u32 1, %s2096_s18   ;;  %p2923_p2 = scmp.ne.s32.totalorder %s2913_s6, 0 }
 0x3a1   : > { %p2924_p10 = scmp.ge.s32.totalorder %s2108_s21, 2  ;;  %s1636_s15 = scalar_lea.sflag [#allocation4], %s1635_s12 }
 0x3a3   : > { %p1797_p8 = pnand %p2924_p10, %p2923_p2 }
 0x3a5   : > { %p1798_p6 = pneg %p1797_p8 }
 0x3a7   : > { %2091 = dma.done.wait (%p1798_p6), %s1636_s15, 2560  }
 0x3a8   : > { %2093 = vsyncadd (%p1798_p6), %s1636_s15, 4294964736  ;;  %p22_p0 = scmp.ge.s32.totalorder %s2179_s24, 4   ;;  %s2925_s18 = smov %s2100_s19 }
 0x3a9   : > { %s2926_s19 = smov %s2104_s20  ;;  %s2927_s20 = smov %s2191_s27 }
 0x3aa   : > { %s2928_s21 = smov %s2179_s24  ;;  %24 = sbr.rel (!%p22_p0) target bundleno = 10 (0xa), region = 106 }
 0x3af   :  { %1641 = vsyncpa [#allocation3], 1 }
 0x3b0   :  { %1643 = vsyncpa [#allocation3 + $0x1], 1 }
 0x3b1   :  { %1644 = vsyncpa [#allocation6], 1 }
 0x3b2   :  { %1646 = vsyncpa [#allocation6 + $0x1], 1 }
 0x3b3   :  { %1647 = vsyncpa [#allocation9], 1 }
 0x3b4   :  { %1648 = vsyncpa [#allocation4], 1 }
 0x3b5   :  { %1650 = vsyncpa [#allocation4 + $0x1], 1 }

</bundles_post_ra>
